<compile_context>
chip_gen: v5e
topology: v5e:2x2
jax: 0.10.0
libtpu: 0.0.40
codegen_flags: <defaults>
</compile_context>

<pallas_src>
import functools

import jax
import jax.numpy as jnp
from jax import lax
from jax.experimental import pallas as pl
from jax.experimental.pallas import tpu as pltpu

K = 3                       # conv kernel size (fixed by the module)
STRIDES = (1, 2, 2, 1)      # strides of the four Conv1d layers


def _round_up(x, m):
    return ((x + m - 1) // m) * m


def _elu(x):
    # clamp the exp argument so the discarded branch never produces inf
    return jnp.where(x > 0, x, jnp.exp(jnp.minimum(x, 0.0)) - 1.0)


def cnn1d_kernel(x_ref, p_ref, out_ref, *, bp, length, c, cr, h_dim, ncp, offs):
    """x_ref: (L*BP, C) activation slab.  p_ref: (N, 128) packed parameters.

    out_ref: (BP, 128) lane-dense output tile (top-left (B, NC) is the answer).
    """
    cw_off, cb_off, f1w_off, f1b_off, f2w_off, f2b_off = offs

    h = x_ref[...]                                        # (L*BP, C)
    lin = length
    for li, stride in enumerate(STRIDES):
        lfull = lin - K + 1                               # stride-1 output length
        acc = None
        for k in range(K):                                # K shifted, 8-row-aligned slices
            hk = h[k * bp:(k + lfull) * bp, :]            # contiguous rows, static slice
            r0 = cw_off + (li * K + k) * cr
            wk = p_ref[r0:r0 + c, 0:c]                    # (Cin, Cout) tap weight
            y = jnp.dot(hk, wk, preferred_element_type=jnp.float32)
            acc = y if acc is None else acc + y
        if stride > 1:
            # Decimate: keep the 8-row block of every stride-th position.
            # Aligned slices + concat (no selection matmul, no iotas).
            lout = (lin - K) // stride + 1
            acc = jnp.concatenate(
                [acc[q * stride * bp:(q * stride + 1) * bp, :] for q in range(lout)],
                axis=0)
        else:
            lout = lfull
        b_row = p_ref[cb_off + li:cb_off + li + 1, 0:c]   # (1, Cout) bias
        h = _elu(acc + b_row)
        lin = lout

    # Global average pool over the remaining positions: sum of aligned (BP, C)
    # blocks; the 1/lin scale is folded into fc1's weight host-side.
    pooled = h[0:bp, :]
    for t in range(1, lin):
        pooled = pooled + h[t * bp:(t + 1) * bp, :]

    # TODO(synk): F.dropout uses PyTorch's stateful RNG; treated as identity (inference / p=0).
    w1 = p_ref[f1w_off:f1w_off + c, 0:h_dim]              # (C, H), pre-scaled by 1/lin
    b1 = p_ref[f1b_off:f1b_off + 1, 0:h_dim]              # (1, H)
    z = jnp.maximum(jnp.dot(pooled, w1, preferred_element_type=jnp.float32) + b1, 0.0)

    w2 = p_ref[f2w_off:f2w_off + h_dim, 0:ncp]            # (H, 128), classes zero-padded
    b2 = p_ref[f2b_off:f2b_off + 1, 0:ncp]                # (1, 128)
    out_ref[...] = jnp.dot(z, w2, preferred_element_type=jnp.float32) + b2


def cnn1d_forward(x_ncl, params):
    """x_ncl: (B, C_in, L) float32.  params: dict of raw (PyTorch-shaped) params."""
    B, cin0, L = x_ncl.shape
    C = params["conv1_w"].shape[0]            # num_channels
    H = params["fc1_w"].shape[0]              # hidden_dim
    NC = params["fc2_w"].shape[0]             # num_classes
    assert cin0 <= C, "kernel packs conv1's Cin into num_channels lanes"
    assert C <= 128 and H <= 128 and NC <= 128, "single-lane-tile packing assumed"

    BP = _round_up(B, 8)                      # batch padded to full sublanes
    CR = _round_up(C, 8)                      # rows per packed conv-tap block
    HR = _round_up(H, 8)
    NCP = 128                                 # lane-dense output tile width

    # Conv output lengths (valid conv); final length's reciprocal folds into fc1_w.
    lin = L
    for s in STRIDES:
        lin = (lin - K) // s + 1
        assert lin >= 1, "input too short for the conv stack"
    lout_final = lin

    # ---- input slab: (L*BP, C), rows length-major / batch-minor, zero-padded ----
    x3 = jnp.transpose(x_ncl, (2, 0, 1)).astype(jnp.float32)   # (L, B, cin0)
    x3 = jnp.pad(x3, ((0, 0), (0, BP - B), (0, C - cin0)))
    x2d = x3.reshape(L * BP, C)

    # ---- single packed, lane-dense (N, 128) parameter buffer ----
    cw_off = 0
    cb_off = cw_off + 4 * K * CR
    f1w_off = _round_up(cb_off + 4, 8)
    f1b_off = f1w_off + CR
    f2w_off = _round_up(f1b_off + 1, 8)
    f2b_off = f2w_off + HR
    prows = _round_up(f2b_off + 1, 8)

    pbuf = jnp.zeros((prows, 128), jnp.float32)
    for i in (1, 2, 3, 4):
        w = jnp.transpose(params[f"conv{i}_w"], (2, 1, 0))      # (K, cin_i, C)
        for k in range(K):
            r0 = cw_off + ((i - 1) * K + k) * CR
            pbuf = pbuf.at[r0:r0 + w.shape[1], 0:C].set(w[k])
        pbuf = pbuf.at[cb_off + (i - 1), 0:C].set(params[f"conv{i}_b"])
    # fc1 weight pre-scaled by 1/lout_final (folds the average pooling divide).
    pbuf = pbuf.at[f1w_off:f1w_off + C, 0:H].set(params["fc1_w"].T / float(lout_final))
    pbuf = pbuf.at[f1b_off, 0:H].set(params["fc1_b"])
    pbuf = pbuf.at[f2w_off:f2w_off + H, 0:NC].set(params["fc2_w"].T)
    pbuf = pbuf.at[f2b_off, 0:NC].set(params["fc2_b"])

    kernel = functools.partial(
        cnn1d_kernel, bp=BP, length=L, c=C, cr=CR, h_dim=H, ncp=NCP,
        offs=(cw_off, cb_off, f1w_off, f1b_off, f2w_off, f2b_off))

    # Whole problem is a few hundred KiB: gridless, everything VMEM-resident.
    # (At scaled-up B/L: add a leading "parallel" batch grid axis for v7x's two
    #  TensorCores and size the tile against its 64 MiB VMEM / set
    #  vmem_limit_bytes via pltpu.CompilerParams.)
    vmem = pl.BlockSpec(memory_space=pltpu.MemorySpace.VMEM)
    out = pl.pallas_call(
        kernel,
        out_shape=jax.ShapeDtypeStruct((BP, NCP), jnp.float32),
        in_specs=[vmem, vmem],
        out_specs=vmem,
    )(x2d, pbuf)
    return out[:B, :NC]


# ----------------------------- reference (plain JAX) ------------------------
def ref_forward(x, params):
    h = x
    for i, s in zip((1, 2, 3, 4), STRIDES):
        w, b = params[f"conv{i}_w"], params[f"conv{i}_b"]
        h = lax.conv_general_dilated(h, w, window_strides=(s,), padding="VALID",
                                     dimension_numbers=("NCH", "OIH", "NCH"))
        h = h + b[None, :, None]
        h = jnp.where(h > 0, h, jnp.exp(jnp.minimum(h, 0.0)) - 1.0)
    feats = jnp.mean(h, axis=-1)
    z = jnp.maximum(feats @ params["fc1_w"].T + params["fc1_b"], 0.0)
    return z @ params["fc2_w"].T + params["fc2_b"]


def init_params(key, initial_num_channels, num_channels, hidden_dim, num_classes):
    def uinit(k, shape, fan_in):
        bound = 1.0 / jnp.sqrt(fan_in)
        return jax.random.uniform(k, shape, jnp.float32, -bound, bound)

    keys = jax.random.split(key, 12)
    p = {}
    cin = initial_num_channels
    for i in (1, 2, 3, 4):
        fan = cin * K
        p[f"conv{i}_w"] = uinit(keys[2 * (i - 1)], (num_channels, cin, K), fan)
        p[f"conv{i}_b"] = uinit(keys[2 * (i - 1) + 1], (num_channels,), fan)
        cin = num_channels
    p["fc1_w"] = uinit(keys[8], (hidden_dim, num_channels), num_channels)
    p["fc1_b"] = uinit(keys[9], (hidden_dim,), num_channels)
    p["fc2_w"] = uinit(keys[10], (num_classes, hidden_dim), hidden_dim)
    p["fc2_b"] = uinit(keys[11], (num_classes,), hidden_dim)
    return p


if __name__ == "__main__":
    B = 2
    initial_num_channels = 4
    num_channels = 8
    hidden_dim = 32
    num_classes = 5
    L = 32  # 32 -> 30 -> 14 -> 6 -> 4 after the four valid convs

    key = jax.random.PRNGKey(0)
    k_x, k_p = jax.random.split(key)
    x = jax.random.normal(k_x, (B, initial_num_channels, L), jnp.float32)
    params = init_params(k_p, initial_num_channels, num_channels,
                         hidden_dim, num_classes)

    out = cnn1d_forward(x, params)
    out = jax.block_until_ready(out)

    ref = ref_forward(x, params)
    assert out.shape == (B, num_classes)
    assert jnp.allclose(out, ref, rtol=1e-5, atol=1e-5), (out, ref)

    print("KERNEL_OK")
</pallas_src>

<mosaic_0001>
module attributes {stable_mosaic.version = 11 : i64} {
  func.func @cnn1d_kernel(%arg0: memref<256x8xf32, #tpu.memory_space<vmem>>, %arg1: memref<160x128xf32, #tpu.memory_space<vmem>>, %arg2: memref<8x128xf32, #tpu.memory_space<vmem>>) attributes {dimension_semantics = [], scalar_prefetch = 0 : i64, scratch_operands = 0 : i64, tpu.core_type = #tpu.core_type<tc>} {
    %c0 = arith.constant 0 : index
    %c0_0 = arith.constant 0 : index
    %0 = vector.load %arg0[%c0, %c0_0] : memref<256x8xf32, #tpu.memory_space<vmem>>, vector<256x8xf32>
    %1 = vector.extract_strided_slice %0 {offsets = [0, 0], sizes = [240, 8], strides = [1, 1]} : vector<256x8xf32> to vector<240x8xf32>
    %c0_1 = arith.constant 0 : index
    %c0_2 = arith.constant 0 : index
    %2 = vector.load %arg1[%c0_1, %c0_2] : memref<160x128xf32, #tpu.memory_space<vmem>>, vector<8x8xf32>
    %cst = arith.constant dense<0.000000e+00> : vector<240x8xf32>
    %3 = tpu.matmul %1, %2, %cst {dimension_numbers = #tpu.dot_dimension_numbers<[1], [0], [0], [1], [0, 0, 1, 1], [], []>} : vector<240x8xf32>, vector<8x8xf32>, vector<240x8xf32> -> vector<240x8xf32>
    %4 = vector.extract_strided_slice %0 {offsets = [8, 0], sizes = [240, 8], strides = [1, 1]} : vector<256x8xf32> to vector<240x8xf32>
    %c8 = arith.constant 8 : index
    %c0_3 = arith.constant 0 : index
    %5 = vector.load %arg1[%c8, %c0_3] : memref<160x128xf32, #tpu.memory_space<vmem>>, vector<8x8xf32>
    %cst_4 = arith.constant dense<0.000000e+00> : vector<240x8xf32>
    %6 = tpu.matmul %4, %5, %cst_4 {dimension_numbers = #tpu.dot_dimension_numbers<[1], [0], [0], [1], [0, 0, 1, 1], [], []>} : vector<240x8xf32>, vector<8x8xf32>, vector<240x8xf32> -> vector<240x8xf32>
    %7 = arith.addf %3, %6 : vector<240x8xf32>
    %8 = vector.extract_strided_slice %0 {offsets = [16, 0], sizes = [240, 8], strides = [1, 1]} : vector<256x8xf32> to vector<240x8xf32>
    %c16 = arith.constant 16 : index
    %c0_5 = arith.constant 0 : index
    %9 = vector.load %arg1[%c16, %c0_5] : memref<160x128xf32, #tpu.memory_space<vmem>>, vector<8x8xf32>
    %cst_6 = arith.constant dense<0.000000e+00> : vector<240x8xf32>
    %10 = tpu.matmul %8, %9, %cst_6 {dimension_numbers = #tpu.dot_dimension_numbers<[1], [0], [0], [1], [0, 0, 1, 1], [], []>} : vector<240x8xf32>, vector<8x8xf32>, vector<240x8xf32> -> vector<240x8xf32>
    %11 = arith.addf %7, %10 : vector<240x8xf32>
    %c96 = arith.constant 96 : index
    %c0_7 = arith.constant 0 : index
    %12 = vector.load %arg1[%c96, %c0_7] : memref<160x128xf32, #tpu.memory_space<vmem>>, vector<1x8xf32>
    %13 = vector.broadcast %12 : vector<1x8xf32> to vector<240x8xf32>
    %14 = arith.addf %11, %13 : vector<240x8xf32>
    %cst_8 = arith.constant 0.000000e+00 : f32
    %15 = vector.broadcast %cst_8 : f32 to vector<240x8xf32>
    %16 = arith.cmpf ogt, %14, %15 : vector<240x8xf32>
    %cst_9 = arith.constant 0.000000e+00 : f32
    %17 = vector.broadcast %cst_9 : f32 to vector<240x8xf32>
    %18 = arith.minimumf %14, %17 : vector<240x8xf32>
    %19 = math.exp %18 : vector<240x8xf32>
    %cst_10 = arith.constant 1.000000e+00 : f32
    %20 = vector.broadcast %cst_10 : f32 to vector<240x8xf32>
    %21 = arith.subf %19, %20 : vector<240x8xf32>
    %22 = arith.select %16, %14, %21 : vector<240x8xi1>, vector<240x8xf32>
    %23 = vector.extract_strided_slice %22 {offsets = [0, 0], sizes = [224, 8], strides = [1, 1]} : vector<240x8xf32> to vector<224x8xf32>
    %c24 = arith.constant 24 : index
    %c0_11 = arith.constant 0 : index
    %24 = vector.load %arg1[%c24, %c0_11] : memref<160x128xf32, #tpu.memory_space<vmem>>, vector<8x8xf32>
    %cst_12 = arith.constant dense<0.000000e+00> : vector<224x8xf32>
    %25 = tpu.matmul %23, %24, %cst_12 {dimension_numbers = #tpu.dot_dimension_numbers<[1], [0], [0], [1], [0, 0, 1, 1], [], []>} : vector<224x8xf32>, vector<8x8xf32>, vector<224x8xf32> -> vector<224x8xf32>
    %26 = vector.extract_strided_slice %22 {offsets = [8, 0], sizes = [224, 8], strides = [1, 1]} : vector<240x8xf32> to vector<224x8xf32>
    %c32 = arith.constant 32 : index
    %c0_13 = arith.constant 0 : index
    %27 = vector.load %arg1[%c32, %c0_13] : memref<160x128xf32, #tpu.memory_space<vmem>>, vector<8x8xf32>
    %cst_14 = arith.constant dense<0.000000e+00> : vector<224x8xf32>
    %28 = tpu.matmul %26, %27, %cst_14 {dimension_numbers = #tpu.dot_dimension_numbers<[1], [0], [0], [1], [0, 0, 1, 1], [], []>} : vector<224x8xf32>, vector<8x8xf32>, vector<224x8xf32> -> vector<224x8xf32>
    %29 = arith.addf %25, %28 : vector<224x8xf32>
    %30 = vector.extract_strided_slice %22 {offsets = [16, 0], sizes = [224, 8], strides = [1, 1]} : vector<240x8xf32> to vector<224x8xf32>
    %c40 = arith.constant 40 : index
    %c0_15 = arith.constant 0 : index
    %31 = vector.load %arg1[%c40, %c0_15] : memref<160x128xf32, #tpu.memory_space<vmem>>, vector<8x8xf32>
    %cst_16 = arith.constant dense<0.000000e+00> : vector<224x8xf32>
    %32 = tpu.matmul %30, %31, %cst_16 {dimension_numbers = #tpu.dot_dimension_numbers<[1], [0], [0], [1], [0, 0, 1, 1], [], []>} : vector<224x8xf32>, vector<8x8xf32>, vector<224x8xf32> -> vector<224x8xf32>
    %33 = arith.addf %29, %32 : vector<224x8xf32>
    %34 = vector.extract_strided_slice %33 {offsets = [0, 0], sizes = [8, 8], strides = [1, 1]} : vector<224x8xf32> to vector<8x8xf32>
    %35 = vector.extract_strided_slice %33 {offsets = [16, 0], sizes = [8, 8], strides = [1, 1]} : vector<224x8xf32> to vector<8x8xf32>
    %36 = vector.extract_strided_slice %33 {offsets = [32, 0], sizes = [8, 8], strides = [1, 1]} : vector<224x8xf32> to vector<8x8xf32>
    %37 = vector.extract_strided_slice %33 {offsets = [48, 0], sizes = [8, 8], strides = [1, 1]} : vector<224x8xf32> to vector<8x8xf32>
    %38 = vector.extract_strided_slice %33 {offsets = [64, 0], sizes = [8, 8], strides = [1, 1]} : vector<224x8xf32> to vector<8x8xf32>
    %39 = vector.extract_strided_slice %33 {offsets = [80, 0], sizes = [8, 8], strides = [1, 1]} : vector<224x8xf32> to vector<8x8xf32>
    %40 = vector.extract_strided_slice %33 {offsets = [96, 0], sizes = [8, 8], strides = [1, 1]} : vector<224x8xf32> to vector<8x8xf32>
    %41 = vector.extract_strided_slice %33 {offsets = [112, 0], sizes = [8, 8], strides = [1, 1]} : vector<224x8xf32> to vector<8x8xf32>
    %42 = vector.extract_strided_slice %33 {offsets = [128, 0], sizes = [8, 8], strides = [1, 1]} : vector<224x8xf32> to vector<8x8xf32>
    %43 = vector.extract_strided_slice %33 {offsets = [144, 0], sizes = [8, 8], strides = [1, 1]} : vector<224x8xf32> to vector<8x8xf32>
    %44 = vector.extract_strided_slice %33 {offsets = [160, 0], sizes = [8, 8], strides = [1, 1]} : vector<224x8xf32> to vector<8x8xf32>
    %45 = vector.extract_strided_slice %33 {offsets = [176, 0], sizes = [8, 8], strides = [1, 1]} : vector<224x8xf32> to vector<8x8xf32>
    %46 = vector.extract_strided_slice %33 {offsets = [192, 0], sizes = [8, 8], strides = [1, 1]} : vector<224x8xf32> to vector<8x8xf32>
    %47 = vector.extract_strided_slice %33 {offsets = [208, 0], sizes = [8, 8], strides = [1, 1]} : vector<224x8xf32> to vector<8x8xf32>
    %48 = tpu.concatenate %34, %35, %36, %37, %38, %39, %40, %41, %42, %43, %44, %45, %46, %47 in 0 : vector<8x8xf32>, vector<8x8xf32>, vector<8x8xf32>, vector<8x8xf32>, vector<8x8xf32>, vector<8x8xf32>, vector<8x8xf32>, vector<8x8xf32>, vector<8x8xf32>, vector<8x8xf32>, vector<8x8xf32>, vector<8x8xf32>, vector<8x8xf32>, vector<8x8xf32> -> vector<112x8xf32>
    %c97 = arith.constant 97 : index
    %c0_17 = arith.constant 0 : index
    %49 = vector.load %arg1[%c97, %c0_17] : memref<160x128xf32, #tpu.memory_space<vmem>>, vector<1x8xf32>
    %50 = vector.broadcast %49 : vector<1x8xf32> to vector<112x8xf32>
    %51 = arith.addf %48, %50 : vector<112x8xf32>
    %cst_18 = arith.constant 0.000000e+00 : f32
    %52 = vector.broadcast %cst_18 : f32 to vector<112x8xf32>
    %53 = arith.cmpf ogt, %51, %52 : vector<112x8xf32>
    %cst_19 = arith.constant 0.000000e+00 : f32
    %54 = vector.broadcast %cst_19 : f32 to vector<112x8xf32>
    %55 = arith.minimumf %51, %54 : vector<112x8xf32>
    %56 = math.exp %55 : vector<112x8xf32>
    %cst_20 = arith.constant 1.000000e+00 : f32
    %57 = vector.broadcast %cst_20 : f32 to vector<112x8xf32>
    %58 = arith.subf %56, %57 : vector<112x8xf32>
    %59 = arith.select %53, %51, %58 : vector<112x8xi1>, vector<112x8xf32>
    %60 = vector.extract_strided_slice %59 {offsets = [0, 0], sizes = [96, 8], strides = [1, 1]} : vector<112x8xf32> to vector<96x8xf32>
    %c48 = arith.constant 48 : index
    %c0_21 = arith.constant 0 : index
    %61 = vector.load %arg1[%c48, %c0_21] : memref<160x128xf32, #tpu.memory_space<vmem>>, vector<8x8xf32>
    %cst_22 = arith.constant dense<0.000000e+00> : vector<96x8xf32>
    %62 = tpu.matmul %60, %61, %cst_22 {dimension_numbers = #tpu.dot_dimension_numbers<[1], [0], [0], [1], [0, 0, 1, 1], [], []>} : vector<96x8xf32>, vector<8x8xf32>, vector<96x8xf32> -> vector<96x8xf32>
    %63 = vector.extract_strided_slice %59 {offsets = [8, 0], sizes = [96, 8], strides = [1, 1]} : vector<112x8xf32> to vector<96x8xf32>
    %c56 = arith.constant 56 : index
    %c0_23 = arith.constant 0 : index
    %64 = vector.load %arg1[%c56, %c0_23] : memref<160x128xf32, #tpu.memory_space<vmem>>, vector<8x8xf32>
    %cst_24 = arith.constant dense<0.000000e+00> : vector<96x8xf32>
    %65 = tpu.matmul %63, %64, %cst_24 {dimension_numbers = #tpu.dot_dimension_numbers<[1], [0], [0], [1], [0, 0, 1, 1], [], []>} : vector<96x8xf32>, vector<8x8xf32>, vector<96x8xf32> -> vector<96x8xf32>
    %66 = arith.addf %62, %65 : vector<96x8xf32>
    %67 = vector.extract_strided_slice %59 {offsets = [16, 0], sizes = [96, 8], strides = [1, 1]} : vector<112x8xf32> to vector<96x8xf32>
    %c64 = arith.constant 64 : index
    %c0_25 = arith.constant 0 : index
    %68 = vector.load %arg1[%c64, %c0_25] : memref<160x128xf32, #tpu.memory_space<vmem>>, vector<8x8xf32>
    %cst_26 = arith.constant dense<0.000000e+00> : vector<96x8xf32>
    %69 = tpu.matmul %67, %68, %cst_26 {dimension_numbers = #tpu.dot_dimension_numbers<[1], [0], [0], [1], [0, 0, 1, 1], [], []>} : vector<96x8xf32>, vector<8x8xf32>, vector<96x8xf32> -> vector<96x8xf32>
    %70 = arith.addf %66, %69 : vector<96x8xf32>
    %71 = vector.extract_strided_slice %70 {offsets = [0, 0], sizes = [8, 8], strides = [1, 1]} : vector<96x8xf32> to vector<8x8xf32>
    %72 = vector.extract_strided_slice %70 {offsets = [16, 0], sizes = [8, 8], strides = [1, 1]} : vector<96x8xf32> to vector<8x8xf32>
    %73 = vector.extract_strided_slice %70 {offsets = [32, 0], sizes = [8, 8], strides = [1, 1]} : vector<96x8xf32> to vector<8x8xf32>
    %74 = vector.extract_strided_slice %70 {offsets = [48, 0], sizes = [8, 8], strides = [1, 1]} : vector<96x8xf32> to vector<8x8xf32>
    %75 = vector.extract_strided_slice %70 {offsets = [64, 0], sizes = [8, 8], strides = [1, 1]} : vector<96x8xf32> to vector<8x8xf32>
    %76 = vector.extract_strided_slice %70 {offsets = [80, 0], sizes = [8, 8], strides = [1, 1]} : vector<96x8xf32> to vector<8x8xf32>
    %77 = tpu.concatenate %71, %72, %73, %74, %75, %76 in 0 : vector<8x8xf32>, vector<8x8xf32>, vector<8x8xf32>, vector<8x8xf32>, vector<8x8xf32>, vector<8x8xf32> -> vector<48x8xf32>
    %c98 = arith.constant 98 : index
    %c0_27 = arith.constant 0 : index
    %78 = vector.load %arg1[%c98, %c0_27] : memref<160x128xf32, #tpu.memory_space<vmem>>, vector<1x8xf32>
    %79 = vector.broadcast %78 : vector<1x8xf32> to vector<48x8xf32>
    %80 = arith.addf %77, %79 : vector<48x8xf32>
    %cst_28 = arith.constant 0.000000e+00 : f32
    %81 = vector.broadcast %cst_28 : f32 to vector<48x8xf32>
    %82 = arith.cmpf ogt, %80, %81 : vector<48x8xf32>
    %cst_29 = arith.constant 0.000000e+00 : f32
    %83 = vector.broadcast %cst_29 : f32 to vector<48x8xf32>
    %84 = arith.minimumf %80, %83 : vector<48x8xf32>
    %85 = math.exp %84 : vector<48x8xf32>
    %cst_30 = arith.constant 1.000000e+00 : f32
    %86 = vector.broadcast %cst_30 : f32 to vector<48x8xf32>
    %87 = arith.subf %85, %86 : vector<48x8xf32>
    %88 = arith.select %82, %80, %87 : vector<48x8xi1>, vector<48x8xf32>
    %89 = vector.extract_strided_slice %88 {offsets = [0, 0], sizes = [32, 8], strides = [1, 1]} : vector<48x8xf32> to vector<32x8xf32>
    %c72 = arith.constant 72 : index
    %c0_31 = arith.constant 0 : index
    %90 = vector.load %arg1[%c72, %c0_31] : memref<160x128xf32, #tpu.memory_space<vmem>>, vector<8x8xf32>
    %cst_32 = arith.constant dense<0.000000e+00> : vector<32x8xf32>
    %91 = tpu.matmul %89, %90, %cst_32 {dimension_numbers = #tpu.dot_dimension_numbers<[1], [0], [0], [1], [0, 0, 1, 1], [], []>} : vector<32x8xf32>, vector<8x8xf32>, vector<32x8xf32> -> vector<32x8xf32>
    %92 = vector.extract_strided_slice %88 {offsets = [8, 0], sizes = [32, 8], strides = [1, 1]} : vector<48x8xf32> to vector<32x8xf32>
    %c80 = arith.constant 80 : index
    %c0_33 = arith.constant 0 : index
    %93 = vector.load %arg1[%c80, %c0_33] : memref<160x128xf32, #tpu.memory_space<vmem>>, vector<8x8xf32>
    %cst_34 = arith.constant dense<0.000000e+00> : vector<32x8xf32>
    %94 = tpu.matmul %92, %93, %cst_34 {dimension_numbers = #tpu.dot_dimension_numbers<[1], [0], [0], [1], [0, 0, 1, 1], [], []>} : vector<32x8xf32>, vector<8x8xf32>, vector<32x8xf32> -> vector<32x8xf32>
    %95 = arith.addf %91, %94 : vector<32x8xf32>
    %96 = vector.extract_strided_slice %88 {offsets = [16, 0], sizes = [32, 8], strides = [1, 1]} : vector<48x8xf32> to vector<32x8xf32>
    %c88 = arith.constant 88 : index
    %c0_35 = arith.constant 0 : index
    %97 = vector.load %arg1[%c88, %c0_35] : memref<160x128xf32, #tpu.memory_space<vmem>>, vector<8x8xf32>
    %cst_36 = arith.constant dense<0.000000e+00> : vector<32x8xf32>
    %98 = tpu.matmul %96, %97, %cst_36 {dimension_numbers = #tpu.dot_dimension_numbers<[1], [0], [0], [1], [0, 0, 1, 1], [], []>} : vector<32x8xf32>, vector<8x8xf32>, vector<32x8xf32> -> vector<32x8xf32>
    %99 = arith.addf %95, %98 : vector<32x8xf32>
    %c99 = arith.constant 99 : index
    %c0_37 = arith.constant 0 : index
    %100 = vector.load %arg1[%c99, %c0_37] : memref<160x128xf32, #tpu.memory_space<vmem>>, vector<1x8xf32>
    %101 = vector.broadcast %100 : vector<1x8xf32> to vector<32x8xf32>
    %102 = arith.addf %99, %101 : vector<32x8xf32>
    %cst_38 = arith.constant 0.000000e+00 : f32
    %103 = vector.broadcast %cst_38 : f32 to vector<32x8xf32>
    %104 = arith.cmpf ogt, %102, %103 : vector<32x8xf32>
    %cst_39 = arith.constant 0.000000e+00 : f32
    %105 = vector.broadcast %cst_39 : f32 to vector<32x8xf32>
    %106 = arith.minimumf %102, %105 : vector<32x8xf32>
    %107 = math.exp %106 : vector<32x8xf32>
    %cst_40 = arith.constant 1.000000e+00 : f32
    %108 = vector.broadcast %cst_40 : f32 to vector<32x8xf32>
    %109 = arith.subf %107, %108 : vector<32x8xf32>
    %110 = arith.select %104, %102, %109 : vector<32x8xi1>, vector<32x8xf32>
    %111 = vector.extract_strided_slice %110 {offsets = [0, 0], sizes = [8, 8], strides = [1, 1]} : vector<32x8xf32> to vector<8x8xf32>
    %112 = vector.extract_strided_slice %110 {offsets = [8, 0], sizes = [8, 8], strides = [1, 1]} : vector<32x8xf32> to vector<8x8xf32>
    %113 = arith.addf %111, %112 : vector<8x8xf32>
    %114 = vector.extract_strided_slice %110 {offsets = [16, 0], sizes = [8, 8], strides = [1, 1]} : vector<32x8xf32> to vector<8x8xf32>
    %115 = arith.addf %113, %114 : vector<8x8xf32>
    %116 = vector.extract_strided_slice %110 {offsets = [24, 0], sizes = [8, 8], strides = [1, 1]} : vector<32x8xf32> to vector<8x8xf32>
    %117 = arith.addf %115, %116 : vector<8x8xf32>
    %c104 = arith.constant 104 : index
    %c0_41 = arith.constant 0 : index
    %118 = vector.load %arg1[%c104, %c0_41] : memref<160x128xf32, #tpu.memory_space<vmem>>, vector<8x32xf32>
    %c112 = arith.constant 112 : index
    %c0_42 = arith.constant 0 : index
    %119 = vector.load %arg1[%c112, %c0_42] : memref<160x128xf32, #tpu.memory_space<vmem>>, vector<1x32xf32>
    %cst_43 = arith.constant dense<0.000000e+00> : vector<8x32xf32>
    %120 = tpu.matmul %117, %118, %cst_43 {dimension_numbers = #tpu.dot_dimension_numbers<[1], [0], [0], [1], [0, 0, 1, 1], [], []>} : vector<8x8xf32>, vector<8x32xf32>, vector<8x32xf32> -> vector<8x32xf32>
    %121 = vector.broadcast %119 : vector<1x32xf32> to vector<8x32xf32>
    %122 = arith.addf %120, %121 : vector<8x32xf32>
    %cst_44 = arith.constant 0.000000e+00 : f32
    %123 = vector.broadcast %cst_44 : f32 to vector<8x32xf32>
    %124 = arith.maximumf %122, %123 : vector<8x32xf32>
    %c120 = arith.constant 120 : index
    %c0_45 = arith.constant 0 : index
    %125 = vector.load %arg1[%c120, %c0_45] : memref<160x128xf32, #tpu.memory_space<vmem>>, vector<32x128xf32>
    %c152 = arith.constant 152 : index
    %c0_46 = arith.constant 0 : index
    %126 = vector.load %arg1[%c152, %c0_46] : memref<160x128xf32, #tpu.memory_space<vmem>>, vector<1x128xf32>
    %cst_47 = arith.constant dense<0.000000e+00> : vector<8x128xf32>
    %127 = tpu.matmul %124, %125, %cst_47 {dimension_numbers = #tpu.dot_dimension_numbers<[1], [0], [0], [1], [0, 0, 1, 1], [], []>} : vector<8x32xf32>, vector<32x128xf32>, vector<8x128xf32> -> vector<8x128xf32>
    %128 = vector.broadcast %126 : vector<1x128xf32> to vector<8x128xf32>
    %129 = arith.addf %127, %128 : vector<8x128xf32>
    %c0_48 = arith.constant 0 : index
    %c0_49 = arith.constant 0 : index
    %130 = vector.load %arg2[%c0_48, %c0_49] : memref<8x128xf32, #tpu.memory_space<vmem>>, vector<8x128xf32>
    tpu.vector_store %arg2[%c0_48, %c0_49], %129 {strides = array<i32>} : memref<8x128xf32, #tpu.memory_space<vmem>>, vector<8x128xf32>,
    return
  }
}

</mosaic_0001>

<bundles_post_ra>
// kernel: tpu_custom_call.1
= control target key start
LH: loop header
LB: loop body
LE: loop exit
PB: predicated region body
PF: predicated region fallthrough
CT: control target
= control target key end

     0   :  { %vm46_vm0 = vcmask 64512   ;;  %s2802_s0 = inlined_call_operand.vmem [shape: f32[256,8], index: 0, kind: input, shape index: {}]   ;;  %s2803_s1 = inlined_call_operand.vmem [shape: f32[160,128], index: 1, kind: input, shape index: {}]   ;;  %s2804_s2 = inlined_call_operand.hbm [shape: f32[8,128], index: 2, kind: output, shape index: {}]  }
   0x1   :  { %v45_v0 = vld [vmem:[%s2803_s1 + $0x8] sm:$0xff]  ;;  %v2081_v3 = vld [vmem:[%s2802_s0 + $0xf0] sm:$0xff]  ;;  %v44_v5 = vld [vmem:[%s2803_s1] sm:$0xff] }
   0x2   :  { %v13_v1 = vld [vmem:[%s2802_s0 + $0x8] sm:$0xff]  ;;  %152 = vmatpush.msra.mxu0 %v45_v0  ;;  %1908 = vmatpush.msra.mxu1 %v45_v0  ;;  %v354_v4 = vld [vmem:[%s2803_s1 + $0x10] sm:$0xff] }
   0x3   :  { %v2076_v2 = vld [vmem:[%s2802_s0 + $0xe8] sm:$0xff]  ;;  %1909 = vmatpush.msra.mxu2 %v45_v0  ;;  %1630 = vmatmul.msk.f32.vlgmr.msra.gmra.mxu0 %vm46_vm0, %v13_v1 }
   0x4   :  { %1658 = vmatmul.msk.f32.vlgmr.msra.gmra.mxu1 %vm46_vm0, %v2076_v2  ;;  %1659 = vmatmul.msk.f32.vlgmr.msra.gmra.mxu2 %vm46_vm0, %v2081_v3 }
   0x5   :  { %373 = vmatpush.msrb.mxu2 %v354_v4  ;;  %262 = vmatpush.msrb.mxu1 %v44_v5 }
   0x6   :  { %7 = vsyncpa [#allocation3], 0  ;;  %v14_v6 = vld [vmem:[%s2802_s0 + $0x10] sm:$0xff]  ;;  %v12_v7 = vld [vmem:[%s2802_s0] sm:$0xff]  ;;  %s2051_s5 = smov [#allocation2]   ;;  %s1621_s9 = sshll.u32 %s2804_s2, 4  ;;  %s1622_s9 = int_to_ptr.hbm [resolvable:$true] %s1621_s9 }
   0x7   :  { %v15_v8 = vld [vmem:[%s2802_s0 + $0x18] sm:$0xff]  ;;  %v16_v9 = vld [vmem:[%s2802_s0 + $0x20] sm:$0xff]  ;;  %v17_v10 = vld [vmem:[%s2802_s0 + $0x28] sm:$0xff]  ;;  %s1619_s6 = sshll.u32 %s2051_s5, 4  ;;  %s1620_s6 = int_to_ptr.vmem [resolvable:$true] %s1619_s6 }
   0x8   :  { %v18_v11 = vld [vmem:[%s2802_s0 + $0x30] sm:$0xff]  ;;  %v19_v12 = vld [vmem:[%s2802_s0 + $0x38] sm:$0xff]  ;;  %v20_v13 = vld [vmem:[%s2802_s0 + $0x40] sm:$0xff] }
   0x9   :  { %v21_v14 = vld [vmem:[%s2802_s0 + $0x48] sm:$0xff]  ;;  %v22_v15 = vld [vmem:[%s2802_s0 + $0x50] sm:$0xff]  ;;  %v23_v16 = vld [vmem:[%s2802_s0 + $0x58] sm:$0xff] }
   0xa   :  { %v24_v17 = vld [vmem:[%s2802_s0 + $0x60] sm:$0xff]  ;;  %v25_v18 = vld [vmem:[%s2802_s0 + $0x68] sm:$0xff]  ;;  %v26_v19 = vld [vmem:[%s2802_s0 + $0x70] sm:$0xff] }
   0xb   :  { %1631 = vmatmul.msk.f32.gmra.mxu0 %vm46_vm0, %v14_v6  ;;  %v27_v20 = vld [vmem:[%s2802_s0 + $0x78] sm:$0xff]  ;;  %v28_v21 = vld [vmem:[%s2802_s0 + $0x80] sm:$0xff]  ;;  %v29_v23 = vld [vmem:[%s2802_s0 + $0x88] sm:$0xff] }
   0xc   :  { %1660 = vmatmul.msk.f32.vlgmr.msrb.gmra.mxu1 %vm46_vm0, %v12_v7  ;;  %1690 = vmatmul.msk.f32.vlgmr.msrb.gmra.mxu2 %vm46_vm0, %v14_v6  ;;  %v30_v27 = vld [vmem:[%s2802_s0 + $0x90] sm:$0xff]  ;;  %v708_v28 = vld [vmem:[%s2803_s1 + $0x20] sm:$0xff]  ;;  %v707_v31 = vld [vmem:[%s2803_s1 + $0x18] sm:$0xff] }
   0xd   :  { %808 = vmatpush.msra.mxu3 %v708_v28  ;;  %v31_v35 = vld [vmem:[%s2802_s0 + $0x98] sm:$0xff]  ;;  %v970_v38 = vld [vmem:[%s2803_s1 + $0x28] sm:$0xff]  ;;  %v2223_v40 = vld [vmem:[%s2803_s1 + $0x60] ss:$0 sm:$0xff] }
   0xe   :  { %989 = vmatpush.msrb.mxu0 %v970_v38  ;;  %v32_v43 = vld [vmem:[%s2802_s0 + $0xa0] sm:$0xff]  ;;  %v33_v52 = vld [vmem:[%s2802_s0 + $0xa8] sm:$0xff]  ;;  %v34_v63 = vld [vmem:[%s2802_s0 + $0xb0] sm:$0xff] }
   0xf   :  { %898 = vmatpush.msrb.mxu3 %v707_v31 }
  0x13   :  { %1632 = vmatmul.msk.f32.gmra.mxu0 %vm46_vm0, %v15_v8 }
  0x14   :  { %1661 = vmatmul.msk.f32.gmra.mxu1 %vm46_vm0, %v13_v1  ;;  %1691 = vmatmul.msk.f32.gmra.mxu2 %vm46_vm0, %v15_v8 }
  0x1b   :  { %1633 = vmatmul.msk.f32.gmra.mxu0 %vm46_vm0, %v16_v9 }
  0x1c   :  { %1662 = vmatmul.msk.f32.gmra.mxu1 %vm46_vm0, %v14_v6  ;;  %1692 = vmatmul.msk.f32.gmra.mxu2 %vm46_vm0, %v16_v9 }
  0x23   :  { %1634 = vmatmul.msk.f32.gmra.mxu0 %vm46_vm0, %v17_v10 }
  0x24   :  { %1663 = vmatmul.msk.f32.gmra.mxu1 %vm46_vm0, %v15_v8  ;;  %1693 = vmatmul.msk.f32.gmra.mxu2 %vm46_vm0, %v17_v10 }
  0x2b   :  { %1635 = vmatmul.msk.f32.gmra.mxu0 %vm46_vm0, %v18_v11 }
  0x2c   :  { %1664 = vmatmul.msk.f32.gmra.mxu1 %vm46_vm0, %v16_v9  ;;  %1694 = vmatmul.msk.f32.gmra.mxu2 %vm46_vm0, %v18_v11 }
  0x33   :  { %1636 = vmatmul.msk.f32.gmra.mxu0 %vm46_vm0, %v19_v12 }
  0x34   :  { %1665 = vmatmul.msk.f32.gmra.mxu1 %vm46_vm0, %v17_v10  ;;  %1695 = vmatmul.msk.f32.gmra.mxu2 %vm46_vm0, %v19_v12 }
  0x3b   :  { %1637 = vmatmul.msk.f32.gmra.mxu0 %vm46_vm0, %v20_v13 }
  0x3c   :  { %1666 = vmatmul.msk.f32.gmra.mxu1 %vm46_vm0, %v18_v11  ;;  %1696 = vmatmul.msk.f32.gmra.mxu2 %vm46_vm0, %v20_v13 }
  0x43   :  { %1638 = vmatmul.msk.f32.gmra.mxu0 %vm46_vm0, %v21_v14 }
  0x44   :  { %1667 = vmatmul.msk.f32.gmra.mxu1 %vm46_vm0, %v19_v12  ;;  %1697 = vmatmul.msk.f32.gmra.mxu2 %vm46_vm0, %v21_v14 }
  0x4b   :  { %1639 = vmatmul.msk.f32.gmra.mxu0 %vm46_vm0, %v22_v15 }
  0x4c   :  { %1668 = vmatmul.msk.f32.gmra.mxu1 %vm46_vm0, %v20_v13  ;;  %1698 = vmatmul.msk.f32.gmra.mxu2 %vm46_vm0, %v22_v15  ;;  %v35_v13 = vld [vmem:[%s2802_s0 + $0xb8] sm:$0xff] }
  0x53   :  { %1640 = vmatmul.msk.f32.gmra.mxu0 %vm46_vm0, %v23_v16 }
  0x54   :  { %1669 = vmatmul.msk.f32.gmra.mxu1 %vm46_vm0, %v21_v14  ;;  %1699 = vmatmul.msk.f32.gmra.mxu2 %vm46_vm0, %v23_v16 }
  0x5b   :  { %1641 = vmatmul.msk.f32.gmra.mxu0 %vm46_vm0, %v24_v17 }
  0x5c   :  { %1670 = vmatmul.msk.f32.gmra.mxu1 %vm46_vm0, %v22_v15  ;;  %1700 = vmatmul.msk.f32.gmra.mxu2 %vm46_vm0, %v24_v17 }
  0x63   :  { %1642 = vmatmul.msk.f32.gmra.mxu0 %vm46_vm0, %v25_v18 }
  0x64   :  { %1671 = vmatmul.msk.f32.gmra.mxu1 %vm46_vm0, %v23_v16  ;;  %1701 = vmatmul.msk.f32.gmra.mxu2 %vm46_vm0, %v25_v18 }
  0x6b   :  { %1643 = vmatmul.msk.f32.gmra.mxu0 %vm46_vm0, %v26_v19 }
  0x6c   :  { %1672 = vmatmul.msk.f32.gmra.mxu1 %vm46_vm0, %v24_v17  ;;  %1702 = vmatmul.msk.f32.gmra.mxu2 %vm46_vm0, %v26_v19 }
  0x73   :  { %1644 = vmatmul.msk.f32.gmra.mxu0 %vm46_vm0, %v27_v20 }
  0x74   :  { %1673 = vmatmul.msk.f32.gmra.mxu1 %vm46_vm0, %v25_v18  ;;  %1703 = vmatmul.msk.f32.gmra.mxu2 %vm46_vm0, %v27_v20 }
  0x7b   :  { %1645 = vmatmul.msk.f32.gmra.mxu0 %vm46_vm0, %v28_v21 }
  0x7c   :  { %1674 = vmatmul.msk.f32.gmra.mxu1 %vm46_vm0, %v26_v19  ;;  %1704 = vmatmul.msk.f32.gmra.mxu2 %vm46_vm0, %v28_v21 }
  0x80   :  { %v154_v22 = vpop.f32.mrf.mxu0 }
  0x81   :  { %v2190_v24 = vpop.f32.mrf.mxu1 }
  0x83   :  { %1646 = vmatmul.msk.f32.gmra.mxu0 %vm46_vm0, %v29_v23 }
  0x84   :  { %1675 = vmatmul.msk.f32.gmra.mxu1 %vm46_vm0, %v27_v20  ;;  %1705 = vmatmul.msk.f32.gmra.mxu2 %vm46_vm0, %v29_v23 }
  0x87   :  { %v2195_v25 = vpop.f32.mrf.mxu2 }
  0x88   :  { %v157_v26 = vpop.f32.mrf.mxu0 }
  0x89   :  { %v264_v29 = vpop.f32.mrf.mxu1 }
  0x8a   :  { %v265_v30 = vadd.f32 %v264_v29, %v154_v22 }
  0x8b   :  { %1647 = vmatmul.msk.f32.gmra.mxu0 %vm46_vm0, %v30_v27 }
  0x8c   :  { %1676 = vmatmul.msk.f32.gmra.mxu1 %vm46_vm0, %v28_v21  ;;  %1706 = vmatmul.msk.f32.gmra.mxu2 %vm46_vm0, %v30_v27 }
  0x8f   :  { %v375_v32 = vpop.f32.mrf.mxu2 }
  0x90   :  { %v2209_v33 = vadd.f32 %v375_v32, %v265_v30  ;;  %v160_v34 = vpop.f32.mrf.mxu0 }
  0x91   :  { %v267_v36 = vpop.f32.mrf.mxu1 }
  0x92   :  { %v268_v37 = vadd.f32 %v267_v36, %v157_v26 }
  0x93   :  { %1648 = vmatmul.msk.f32.gmra.mxu0 %vm46_vm0, %v31_v35 }
  0x94   :  { %1677 = vmatmul.msk.f32.gmra.mxu1 %vm46_vm0, %v29_v23  ;;  %1707 = vmatmul.msk.f32.gmra.mxu2 %vm46_vm0, %v31_v35 }
  0x97   :  { %v378_v39 = vpop.f32.mrf.mxu2 }
  0x98   :  { %v466_v41 = vadd.f32 %v378_v39, %v268_v37  ;;  %v163_v42 = vpop.f32.mrf.mxu0 }
  0x99   :  { %v270_v44 = vpop.f32.mrf.mxu1 }
  0x9a   :  { %v498_v45 = vadd.f32 %v2223_v40, %v466_v41  ;;  %v271_v47 = vadd.f32 %v270_v44, %v160_v34  ;;  %v37_v41 = vld [vmem:[%s2802_s0 + $0xc8] sm:$0xff] }
  0x9b   :  { %1649 = vmatmul.msk.f32.gmra.mxu0 %vm46_vm0, %v32_v43 }
  0x9c   :  { %v558_v46 = vmin.f32 %v498_v45, 0.0  ;;  %1678 = vmatmul.msk.f32.gmra.mxu1 %vm46_vm0, %v30_v27  ;;  %1708 = vmatmul.msk.f32.gmra.mxu2 %vm46_vm0, %v32_v43  ;;  %vm528_vm1 = vcmp.gt.f32.partialorder %v498_v45, 0.0  ;;  %v36_v27 = vld [vmem:[%s2802_s0 + $0xc0] sm:$0xff] }
  0x9e   :  { %v589_v48 = vmul.f32 1.442695, %v558_v46 }
  0x9f   :  { %v381_v49 = vpop.f32.mrf.mxu2 }
  0xa0   :  { %v467_v50 = vadd.f32 %v381_v49, %v271_v47  ;;  %v166_v51 = vpop.f32.mrf.mxu0  ;;  %1917 = vpow2.f32 %v589_v48 }
  0xa1   :  { %v273_v53 = vpop.f32.mrf.mxu1 }
  0xa2   :  { %v499_v54 = vadd.f32 %v2223_v40, %v467_v50  ;;  %v274_v56 = vadd.f32 %v273_v53, %v163_v42  ;;  %v38_v53 = vld [vmem:[%s2802_s0 + $0xd0] sm:$0xff] }
  0xa3   :  { %1650 = vmatmul.msk.f32.gmra.mxu0 %vm46_vm0, %v33_v52 }
  0xa4   :  { %v559_v55 = vmin.f32 %v499_v54, 0.0  ;;  %1679 = vmatmul.msk.f32.gmra.mxu1 %vm46_vm0, %v31_v35  ;;  %1709 = vmatmul.msk.f32.gmra.mxu2 %vm46_vm0, %v33_v52  ;;  %vm529_vm2 = vcmp.gt.f32.partialorder %v499_v54, 0.0 }
  0xa6   :  { %v1918_v57 = vpop.eup %1917  ;;  %v591_v58 = vmul.f32 1.442695, %v559_v55 }
  0xa7   :  { %v384_v59 = vpop.f32.mrf.mxu2  ;;  %v1721_v60 = vadd.f32 -1.0, %v1918_v57 }
  0xa8   :  { %v468_v61 = vadd.f32 %v384_v59, %v274_v56  ;;  %v169_v62 = vpop.f32.mrf.mxu0  ;;  %1919 = vpow2.f32 %v591_v58 }
  0xa9   :  { %v276_v0 = vpop.f32.mrf.mxu1  ;;  %v2242_v1 = vsel %vm528_vm1, %v498_v45, %v1721_v60 }
  0xaa   :  { %v500_v4 = vadd.f32 %v2223_v40, %v468_v61  ;;  %1750 = vmatmul.msk.f32.vlgmr.msra.gmra.mxu3 %vm46_vm0, %v2242_v1  ;;  %v277_v6 = vadd.f32 %v276_v0, %v166_v51 }
  0xab   :  { %1651 = vmatmul.msk.f32.gmra.mxu0 %vm46_vm0, %v34_v63 }
  0xac   :  { %v560_v5 = vmin.f32 %v500_v4, 0.0  ;;  %1680 = vmatmul.msk.f32.gmra.mxu1 %vm46_vm0, %v32_v43  ;;  %1710 = vmatmul.msk.f32.gmra.mxu2 %vm46_vm0, %v34_v63  ;;  %vm530_vm3 = vcmp.gt.f32.partialorder %v500_v4, 0.0 }
  0xae   :  { %v1920_v7 = vpop.eup %1919  ;;  %v593_v8 = vmul.f32 1.442695, %v560_v5 }
  0xaf   :  { %v387_v9 = vpop.f32.mrf.mxu2  ;;  %v1722_v10 = vadd.f32 -1.0, %v1920_v7 }
  0xb0   :  { %v469_v11 = vadd.f32 %v387_v9, %v277_v6  ;;  %v172_v12 = vpop.f32.mrf.mxu0  ;;  %1921 = vpow2.f32 %v593_v8 }
  0xb1   :  { %v279_v14 = vpop.f32.mrf.mxu1  ;;  %v2253_v15 = vsel %vm529_vm2, %v499_v54, %v1722_v10 }
  0xb2   :  { %v501_v16 = vadd.f32 %v2223_v40, %v469_v11  ;;  %1751 = vmatmul.msk.f32.gmra.mxu3 %vm46_vm0, %v2253_v15  ;;  %v280_v18 = vadd.f32 %v279_v14, %v169_v62 }
  0xb3   :  { %1652 = vmatmul.msk.f32.gmra.mxu0 %vm46_vm0, %v35_v13 }
  0xb4   :  { %v561_v17 = vmin.f32 %v501_v16, 0.0  ;;  %1681 = vmatmul.msk.f32.gmra.mxu1 %vm46_vm0, %v33_v52  ;;  %1711 = vmatmul.msk.f32.gmra.mxu2 %vm46_vm0, %v35_v13  ;;  %vm531_vm4 = vcmp.gt.f32.partialorder %v501_v16, 0.0 }
  0xb6   :  { %v1922_v19 = vpop.eup %1921  ;;  %v595_v20 = vmul.f32 1.442695, %v561_v17  ;;  %v40_v17 = vld [vmem:[%s2802_s0 + $0xe0] sm:$0xff] }
  0xb7   :  { %v390_v21 = vpop.f32.mrf.mxu2  ;;  %v1723_v22 = vadd.f32 -1.0, %v1922_v19 }
  0xb8   :  { %v470_v23 = vadd.f32 %v390_v21, %v280_v18  ;;  %v175_v26 = vpop.f32.mrf.mxu0  ;;  %1923 = vpow2.f32 %v595_v20 }
  0xb9   :  { %v282_v28 = vpop.f32.mrf.mxu1  ;;  %v2264_v29 = vsel %vm530_vm3, %v500_v4, %v1723_v22  ;;  %v39_v4 = vld [vmem:[%s2802_s0 + $0xd8] sm:$0xff] }
  0xba   :  { %v502_v30 = vadd.f32 %v2223_v40, %v470_v23  ;;  %1752 = vmatmul.msk.f32.gmra.mxu3 %vm46_vm0, %v2264_v29  ;;  %v283_v32 = vadd.f32 %v282_v28, %v172_v12 }
  0xbb   :  { %1653 = vmatmul.msk.f32.gmra.mxu0 %vm46_vm0, %v36_v27 }
  0xbc   :  { %v562_v31 = vmin.f32 %v502_v30, 0.0  ;;  %1682 = vmatmul.msk.f32.gmra.mxu1 %vm46_vm0, %v34_v63  ;;  %1712 = vmatmul.msk.f32.gmra.mxu2 %vm46_vm0, %v36_v27  ;;  %vm532_vm5 = vcmp.gt.f32.partialorder %v502_v30, 0.0 }
  0xbe   :  { %v1924_v34 = vpop.eup %1923  ;;  %v597_v35 = vmul.f32 1.442695, %v562_v31 }
  0xbf   :  { %v393_v36 = vpop.f32.mrf.mxu2  ;;  %v1724_v37 = vadd.f32 -1.0, %v1924_v34 }
  0xc0   :  { %v471_v38 = vadd.f32 %v393_v36, %v283_v32  ;;  %v178_v39 = vpop.f32.mrf.mxu0  ;;  %1925 = vpow2.f32 %v597_v35 }
  0xc1   :  { %v285_v42 = vpop.f32.mrf.mxu1  ;;  %v2275_v43 = vsel %vm531_vm4, %v501_v16, %v1724_v37 }
  0xc2   :  { %v503_v44 = vadd.f32 %v2223_v40, %v471_v38  ;;  %1753 = vmatmul.msk.f32.gmra.mxu3 %vm46_vm0, %v2275_v43  ;;  %v286_v46 = vadd.f32 %v285_v42, %v175_v26 }
  0xc3   :  { %1654 = vmatmul.msk.f32.gmra.mxu0 %vm46_vm0, %v37_v41 }
  0xc4   :  { %v563_v45 = vmin.f32 %v503_v44, 0.0  ;;  %1683 = vmatmul.msk.f32.gmra.mxu1 %vm46_vm0, %v35_v13  ;;  %1713 = vmatmul.msk.f32.gmra.mxu2 %vm46_vm0, %v37_v41  ;;  %vm533_vm6 = vcmp.gt.f32.partialorder %v503_v44, 0.0 }
  0xc6   :  { %v1926_v47 = vpop.eup %1925  ;;  %v599_v48 = vmul.f32 1.442695, %v563_v45 }
  0xc7   :  { %v396_v49 = vpop.f32.mrf.mxu2  ;;  %v1725_v50 = vadd.f32 -1.0, %v1926_v47 }
  0xc8   :  { %v472_v51 = vadd.f32 %v396_v49, %v286_v46  ;;  %v181_v52 = vpop.f32.mrf.mxu0  ;;  %1927 = vpow2.f32 %v599_v48 }
  0xc9   :  { %v288_v54 = vpop.f32.mrf.mxu1  ;;  %v2286_v55 = vsel %vm532_vm5, %v502_v30, %v1725_v50 }
  0xca   :  { %v504_v56 = vadd.f32 %v2223_v40, %v472_v51  ;;  %1754 = vmatmul.msk.f32.gmra.mxu3 %vm46_vm0, %v2286_v55  ;;  %v289_v58 = vadd.f32 %v288_v54, %v178_v39 }
  0xcb   :  { %1655 = vmatmul.msk.f32.gmra.mxu0 %vm46_vm0, %v38_v53 }
  0xcc   :  { %v564_v57 = vmin.f32 %v504_v56, 0.0  ;;  %1684 = vmatmul.msk.f32.gmra.mxu1 %vm46_vm0, %v36_v27  ;;  %1714 = vmatmul.msk.f32.gmra.mxu2 %vm46_vm0, %v38_v53  ;;  %vm534_vm7 = vcmp.gt.f32.partialorder %v504_v56, 0.0 }
  0xce   :  { %v1928_v59 = vpop.eup %1927  ;;  %v601_v60 = vmul.f32 1.442695, %v564_v57 }
  0xcf   :  { %v399_v61 = vpop.f32.mrf.mxu2  ;;  %v1726_v62 = vadd.f32 -1.0, %v1928_v59 }
  0xd0   :  { %v473_v63 = vadd.f32 %v399_v61, %v289_v58  ;;  %v184_v0 = vpop.f32.mrf.mxu0  ;;  %1929 = vpow2.f32 %v601_v60  ;;  %v43_v60 = vld [vmem:[%s2802_s0 + $0xf8] sm:$0xff] }
  0xd1   :  { %v291_v5 = vpop.f32.mrf.mxu1  ;;  %v2297_v6 = vsel %vm533_vm6, %v503_v44, %v1726_v62 }
  0xd2   :  { %v505_v7 = vadd.f32 %v2223_v40, %v473_v63  ;;  %1755 = vmatmul.msk.f32.gmra.mxu3 %vm46_vm0, %v2297_v6  ;;  %v292_v9 = vadd.f32 %v291_v5, %v181_v52 }
  0xd3   :  { %1656 = vmatmul.msk.f32.gmra.mxu0 %vm46_vm0, %v39_v4 }
  0xd4   :  { %v565_v8 = vmin.f32 %v505_v7, 0.0  ;;  %1685 = vmatmul.msk.f32.gmra.mxu1 %vm46_vm0, %v37_v41  ;;  %1715 = vmatmul.msk.f32.gmra.mxu2 %vm46_vm0, %v39_v4  ;;  %vm535_vm8 = vcmp.gt.f32.partialorder %v505_v7, 0.0 }
  0xd6   :  { %v1930_v10 = vpop.eup %1929  ;;  %v603_v11 = vmul.f32 1.442695, %v565_v8 }
  0xd7   :  { %v402_v12 = vpop.f32.mrf.mxu2  ;;  %v1727_v13 = vadd.f32 -1.0, %v1930_v10 }
  0xd8   :  { %v474_v14 = vadd.f32 %v402_v12, %v292_v9  ;;  %v187_v16 = vpop.f32.mrf.mxu0  ;;  %1931 = vpow2.f32 %v603_v11 }
  0xd9   :  { %v294_v18 = vpop.f32.mrf.mxu1  ;;  %v2308_v19 = vsel %vm534_vm7, %v504_v56, %v1727_v13 }
  0xda   :  { %v506_v20 = vadd.f32 %v2223_v40, %v474_v14  ;;  %1756 = vmatmul.msk.f32.gmra.mxu3 %vm46_vm0, %v2308_v19  ;;  %v295_v22 = vadd.f32 %v294_v18, %v184_v0 }
  0xdb   :  { %1657 = vmatmul.msk.f32.gmra.mxu0 %vm46_vm0, %v40_v17 }
  0xdc   :  { %v566_v21 = vmin.f32 %v506_v20, 0.0  ;;  %1686 = vmatmul.msk.f32.gmra.mxu1 %vm46_vm0, %v38_v53  ;;  %1716 = vmatmul.msk.f32.gmra.mxu2 %vm46_vm0, %v40_v17  ;;  %vm536_vm9 = vcmp.gt.f32.partialorder %v506_v20, 0.0 }
  0xde   :  { %v1932_v23 = vpop.eup %1931  ;;  %v605_v26 = vmul.f32 1.442695, %v566_v21 }
  0xdf   :  { %v405_v27 = vpop.f32.mrf.mxu2  ;;  %v1728_v28 = vadd.f32 -1.0, %v1932_v23 }
  0xe0   :  { %v475_v30 = vadd.f32 %v405_v27, %v295_v22  ;;  %v190_v31 = vpop.f32.mrf.mxu0  ;;  %1933 = vpow2.f32 %v605_v26 }
  0xe1   :  { %v297_v32 = vpop.f32.mrf.mxu1  ;;  %v2316_v34 = vsel %vm535_vm8, %v505_v7, %v1728_v28 }
  0xe2   :  { %v507_v35 = vadd.f32 %v2223_v40, %v475_v30  ;;  %1757 = vmatmul.msk.f32.gmra.mxu3 %vm46_vm0, %v2316_v34  ;;  %v298_v37 = vadd.f32 %v297_v32, %v187_v16 }
  0xe3   :  { %1806 = vmatmul.msk.f32.vlgmr.msrb.gmra.mxu0 %vm46_vm0, %v2253_v15 }
  0xe4   :  { %v567_v36 = vmin.f32 %v507_v35, 0.0  ;;  %1687 = vmatmul.msk.f32.gmra.mxu1 %vm46_vm0, %v39_v4  ;;  %1717 = vmatmul.msk.f32.gmra.mxu2 %vm46_vm0, %v2076_v2  ;;  %vm537_vm10 = vcmp.gt.f32.partialorder %v507_v35, 0.0 }
  0xe6   :  { %v1934_v38 = vpop.eup %1933  ;;  %v607_v39 = vmul.f32 1.442695, %v567_v36 }
  0xe7   :  { %v408_v41 = vpop.f32.mrf.mxu2  ;;  %v1729_v42 = vadd.f32 -1.0, %v1934_v38 }
  0xe8   :  { %v476_v44 = vadd.f32 %v408_v41, %v298_v37  ;;  %v193_v45 = vpop.f32.mrf.mxu0  ;;  %1935 = vpow2.f32 %v607_v39 }
  0xe9   :  { %v300_v46 = vpop.f32.mrf.mxu1  ;;  %v2326_v47 = vsel %vm536_vm9, %v506_v20, %v1729_v42 }
  0xea   :  { %v508_v48 = vadd.f32 %v2223_v40, %v476_v44  ;;  %1758 = vmatmul.msk.f32.gmra.mxu3 %vm46_vm0, %v2326_v47  ;;  %v301_v50 = vadd.f32 %v300_v46, %v190_v31 }
  0xeb   :  { %1807 = vmatmul.msk.f32.gmra.mxu0 %vm46_vm0, %v2264_v29 }
  0xec   :  { %v568_v49 = vmin.f32 %v508_v48, 0.0  ;;  %1688 = vmatmul.msk.f32.gmra.mxu1 %vm46_vm0, %v40_v17  ;;  %1718 = vmatmul.msk.f32.gmra.mxu2 %vm46_vm0, %v2081_v3  ;;  %vm538_vm11 = vcmp.gt.f32.partialorder %v508_v48, 0.0 }
  0xee   :  { %v1936_v51 = vpop.eup %1935  ;;  %v609_v52 = vmul.f32 1.442695, %v568_v49 }
  0xef   :  { %v411_v53 = vpop.f32.mrf.mxu2  ;;  %v1730_v54 = vadd.f32 -1.0, %v1936_v51 }
  0xf0   :  { %v477_v56 = vadd.f32 %v411_v53, %v301_v50  ;;  %v196_v57 = vpop.f32.mrf.mxu0  ;;  %1937 = vpow2.f32 %v609_v52 }
  0xf1   :  { %v303_v58 = vpop.f32.mrf.mxu1  ;;  %v2336_v59 = vsel %vm537_vm10, %v507_v35, %v1730_v54 }
  0xf2   :  { %v509_v61 = vadd.f32 %v2223_v40, %v477_v56  ;;  %1759 = vmatmul.msk.f32.gmra.mxu3 %vm46_vm0, %v2336_v59  ;;  %v304_v62 = vadd.f32 %v303_v58, %v193_v45 }
  0xf3   :  { %1808 = vmatmul.msk.f32.gmra.mxu0 %vm46_vm0, %v2275_v43 }
  0xf4   :  { %v569_v3 = vmin.f32 %v509_v61, 0.0  ;;  %1689 = vmatmul.msk.f32.gmra.mxu1 %vm46_vm0, %v2076_v2  ;;  %1719 = vmatmul.msk.f32.gmra.mxu2 %vm46_vm0, %v43_v60  ;;  %vm539_vm12 = vcmp.gt.f32.partialorder %v509_v61, 0.0 }
  0xf6   :  { %v1938_v63 = vpop.eup %1937  ;;  %v611_v0 = vmul.f32 1.442695, %v569_v3 }
  0xf7   :  { %v414_v4 = vpop.f32.mrf.mxu2  ;;  %v1731_v5 = vadd.f32 -1.0, %v1938_v63 }
  0xf8   :  { %v478_v7 = vadd.f32 %v414_v4, %v304_v62  ;;  %v199_v8 = vpop.f32.mrf.mxu0  ;;  %1939 = vpow2.f32 %v611_v0 }
  0xf9   :  { %v306_v9 = vpop.f32.mrf.mxu1  ;;  %v2349_v10 = vsel %vm538_vm11, %v508_v48, %v1731_v5 }
  0xfa   :  { %v510_v11 = vadd.f32 %v2223_v40, %v478_v7  ;;  %1760 = vmatmul.msk.f32.gmra.mxu3 %vm46_vm0, %v2349_v10  ;;  %v307_v12 = vadd.f32 %v306_v9, %v196_v57 }
  0xfb   :  { %1809 = vmatmul.msk.f32.gmra.mxu0 %vm46_vm0, %v2286_v55 }
  0xfc   :  { %v570_v2 = vmin.f32 %v510_v11, 0.0  ;;  %vm540_vm13 = vcmp.gt.f32.partialorder %v510_v11, 0.0 }
  0xfe   :  { %v1940_v13 = vpop.eup %1939  ;;  %v613_v14 = vmul.f32 1.442695, %v570_v2 }
  0xff   :  { %v417_v16 = vpop.f32.mrf.mxu2  ;;  %v1732_v17 = vadd.f32 -1.0, %v1940_v13 }
 0x100   :  { %v479_v18 = vadd.f32 %v417_v16, %v307_v12  ;;  %v202_v20 = vpop.f32.mrf.mxu0  ;;  %1941 = vpow2.f32 %v613_v14 }
 0x101   :  { %v309_v21 = vpop.f32.mrf.mxu1  ;;  %v2356_v22 = vsel %vm539_vm12, %v509_v61, %v1732_v17 }
 0x102   :  { %v511_v23 = vadd.f32 %v2223_v40, %v479_v18  ;;  %1761 = vmatmul.msk.f32.gmra.mxu3 %vm46_vm0, %v2356_v22  ;;  %v310_v27 = vadd.f32 %v309_v21, %v199_v8 }
 0x103   :  { %1810 = vmatmul.msk.f32.gmra.mxu0 %vm46_vm0, %v2297_v6 }
 0x104   :  { %v571_v26 = vmin.f32 %v511_v23, 0.0  ;;  %vm541_vm14 = vcmp.gt.f32.partialorder %v511_v23, 0.0 }
 0x106   :  { %v1942_v28 = vpop.eup %1941  ;;  %v615_v30 = vmul.f32 1.442695, %v571_v26 }
 0x107   :  { %v420_v31 = vpop.f32.mrf.mxu2  ;;  %v1733_v32 = vadd.f32 -1.0, %v1942_v28 }
 0x108   :  { %v480_v35 = vadd.f32 %v420_v31, %v310_v27  ;;  %v205_v36 = vpop.f32.mrf.mxu0  ;;  %1943 = vpow2.f32 %v615_v30 }
 0x109   :  { %v312_v37 = vpop.f32.mrf.mxu1  ;;  %v2363_v38 = vsel %vm540_vm13, %v510_v11, %v1733_v32 }
 0x10a   :  { %v512_v39 = vadd.f32 %v2223_v40, %v480_v35  ;;  %1762 = vmatmul.msk.f32.gmra.mxu3 %vm46_vm0, %v2363_v38  ;;  %v313_v42 = vadd.f32 %v312_v37, %v202_v20 }
 0x10b   :  { %1811 = vmatmul.msk.f32.gmra.mxu0 %vm46_vm0, %v2308_v19 }
 0x10c   :  { %v572_v41 = vmin.f32 %v512_v39, 0.0  ;;  %vm542_vm15 = vcmp.gt.f32.partialorder %v512_v39, 0.0 }
 0x10e   :  { %v1944_v44 = vpop.eup %1943  ;;  %v617_v45 = vmul.f32 1.442695, %v572_v41 }
 0x10f   :  { %v423_v46 = vpop.f32.mrf.mxu2  ;;  %v1734_v48 = vadd.f32 -1.0, %v1944_v44 }
 0x110   :  { %v481_v49 = vadd.f32 %v423_v46, %v313_v42  ;;  %v208_v50 = vpop.f32.mrf.mxu0  ;;  %1945 = vpow2.f32 %v617_v45 }
 0x111   :  { %v315_v51 = vpop.f32.mrf.mxu1  ;;  %v2370_v52 = vsel %vm541_vm14, %v511_v23, %v1734_v48 }
 0x112   :  { %v513_v53 = vadd.f32 %v2223_v40, %v481_v49  ;;  %1763 = vmatmul.msk.f32.gmra.mxu3 %vm46_vm0, %v2370_v52  ;;  %v316_v56 = vadd.f32 %v315_v51, %v205_v36 }
 0x113   :  { %1812 = vmatmul.msk.f32.gmra.mxu0 %vm46_vm0, %v2316_v34 }
 0x114   :  { %v573_v54 = vmin.f32 %v513_v53, 0.0  ;;  %vm543_vm1 = vcmp.gt.f32.partialorder %v513_v53, 0.0 }
 0x116   :  { %v1946_v57 = vpop.eup %1945  ;;  %v619_v58 = vmul.f32 1.442695, %v573_v54 }
 0x117   :  { %v426_v60 = vpop.f32.mrf.mxu2  ;;  %v1735_v61 = vadd.f32 -1.0, %v1946_v57 }
 0x118   :  { %v482_v3 = vadd.f32 %v426_v60, %v316_v56  ;;  %v211_v62 = vpop.f32.mrf.mxu0  ;;  %1947 = vpow2.f32 %v619_v58 }
 0x119   :  { %v318_v63 = vpop.f32.mrf.mxu1  ;;  %v2377_v0 = vsel %vm542_vm15, %v512_v39, %v1735_v61 }
 0x11a   :  { %v514_v4 = vadd.f32 %v2223_v40, %v482_v3  ;;  %1764 = vmatmul.msk.f32.gmra.mxu3 %vm46_vm0, %v2377_v0  ;;  %v319_v7 = vadd.f32 %v318_v63, %v208_v50 }
 0x11b   :  { %1813 = vmatmul.msk.f32.gmra.mxu0 %vm46_vm0, %v2326_v47 }
 0x11c   :  { %v574_v5 = vmin.f32 %v514_v4, 0.0  ;;  %vm544_vm2 = vcmp.gt.f32.partialorder %v514_v4, 0.0 }
 0x11e   :  { %v1948_v8 = vpop.eup %1947  ;;  %v621_v9 = vmul.f32 1.442695, %v574_v5 }
 0x11f   :  { %v429_v11 = vpop.f32.mrf.mxu2  ;;  %v1736_v2 = vadd.f32 -1.0, %v1948_v8 }
 0x120   :  { %v483_v12 = vadd.f32 %v429_v11, %v319_v7  ;;  %v214_v13 = vpop.f32.mrf.mxu0  ;;  %1949 = vpow2.f32 %v621_v9 }
 0x121   :  { %v321_v14 = vpop.f32.mrf.mxu1  ;;  %v2384_v16 = vsel %vm543_vm1, %v513_v53, %v1736_v2 }
 0x122   :  { %v515_v17 = vadd.f32 %v2223_v40, %v483_v12  ;;  %1765 = vmatmul.msk.f32.gmra.mxu3 %vm46_vm0, %v2384_v16  ;;  %v322_v20 = vadd.f32 %v321_v14, %v211_v62 }
 0x123   :  { %1814 = vmatmul.msk.f32.gmra.mxu0 %vm46_vm0, %v2336_v59 }
 0x124   :  { %v575_v18 = vmin.f32 %v515_v17, 0.0  ;;  %vm545_vm3 = vcmp.gt.f32.partialorder %v515_v17, 0.0 }
 0x126   :  { %v1950_v21 = vpop.eup %1949  ;;  %v623_v23 = vmul.f32 1.442695, %v575_v18 }
 0x127   :  { %v432_v26 = vpop.f32.mrf.mxu2  ;;  %v1737_v27 = vadd.f32 -1.0, %v1950_v21 }
 0x128   :  { %v484_v28 = vadd.f32 %v432_v26, %v322_v20  ;;  %v217_v30 = vpop.f32.mrf.mxu0  ;;  %1951 = vpow2.f32 %v623_v23 }
 0x129   :  { %v324_v31 = vpop.f32.mrf.mxu1  ;;  %v2391_v32 = vsel %vm544_vm2, %v514_v4, %v1737_v27 }
 0x12a   :  { %v516_v35 = vadd.f32 %v2223_v40, %v484_v28  ;;  %1766 = vmatmul.msk.f32.gmra.mxu3 %vm46_vm0, %v2391_v32  ;;  %v325_v37 = vadd.f32 %v324_v31, %v214_v13 }
 0x12b   :  { %1815 = vmatmul.msk.f32.gmra.mxu0 %vm46_vm0, %v2349_v10 }
 0x12c   :  { %v576_v36 = vmin.f32 %v516_v35, 0.0  ;;  %vm546_vm4 = vcmp.gt.f32.partialorder %v516_v35, 0.0 }
 0x12d   :  { %v2398_v39 = vpop.f32.mrf.mxu3 }
 0x12e   :  { %v1952_v41 = vpop.eup %1951  ;;  %v625_v42 = vmul.f32 1.442695, %v576_v36 }
 0x12f   :  { %v435_v44 = vpop.f32.mrf.mxu2  ;;  %v1738_v45 = vadd.f32 -1.0, %v1952_v41 }
 0x130   :  { %v485_v46 = vadd.f32 %v435_v44, %v325_v37  ;;  %v220_v48 = vpop.f32.mrf.mxu0  ;;  %1953 = vpow2.f32 %v625_v42 }
 0x131   :  { %v327_v49 = vpop.f32.mrf.mxu1  ;;  %v2400_v50 = vsel %vm545_vm3, %v515_v17, %v1738_v45 }
 0x132   :  { %v517_v51 = vadd.f32 %v2223_v40, %v485_v46  ;;  %1767 = vmatmul.msk.f32.gmra.mxu3 %vm46_vm0, %v2400_v50  ;;  %v328_v54 = vadd.f32 %v327_v49, %v217_v30 }
 0x133   :  { %1816 = vmatmul.msk.f32.gmra.mxu0 %vm46_vm0, %v2356_v22 }
 0x134   :  { %v577_v53 = vmin.f32 %v517_v51, 0.0  ;;  %vm547_vm5 = vcmp.gt.f32.partialorder %v517_v51, 0.0 }
 0x135   :  { %v813_v56 = vpop.f32.mrf.mxu3 }
 0x136   :  { %v1954_v57 = vpop.eup %1953  ;;  %v627_v58 = vmul.f32 1.442695, %v577_v53 }
 0x137   :  { %v438_v60 = vpop.f32.mrf.mxu2  ;;  %v1739_v61 = vadd.f32 -1.0, %v1954_v57 }
 0x138   :  { %v486_v3 = vadd.f32 %v438_v60, %v328_v54  ;;  %v223_v62 = vpop.f32.mrf.mxu0  ;;  %1955 = vpow2.f32 %v627_v58 }
 0x139   :  { %v330_v63 = vpop.f32.mrf.mxu1  ;;  %v2407_v4 = vsel %vm546_vm4, %v516_v35, %v1739_v61 }
 0x13a   :  { %v518_v5 = vadd.f32 %v2223_v40, %v486_v3  ;;  %1768 = vmatmul.msk.f32.gmra.mxu3 %vm46_vm0, %v2407_v4  ;;  %v331_v8 = vadd.f32 %v330_v63, %v220_v48 }
 0x13b   :  { %1817 = vmatmul.msk.f32.gmra.mxu0 %vm46_vm0, %v2363_v38 }
 0x13c   :  { %v578_v7 = vmin.f32 %v518_v5, 0.0  ;;  %vm548_vm6 = vcmp.gt.f32.partialorder %v518_v5, 0.0 }
 0x13d   :  { %v2414_v9 = vpop.f32.mrf.mxu3 }
 0x13e   :  { %v1956_v11 = vpop.eup %1955  ;;  %v629_v2 = vmul.f32 1.442695, %v578_v7 }
 0x13f   :  { %v441_v12 = vpop.f32.mrf.mxu2  ;;  %v1740_v13 = vadd.f32 -1.0, %v1956_v11 }
 0x140   :  { %v487_v14 = vadd.f32 %v441_v12, %v331_v8  ;;  %v226_v17 = vpop.f32.mrf.mxu0  ;;  %1957 = vpow2.f32 %v629_v2 }
 0x141   :  { %v333_v18 = vpop.f32.mrf.mxu1  ;;  %v2416_v20 = vsel %vm547_vm5, %v517_v51, %v1740_v13 }
 0x142   :  { %v519_v21 = vadd.f32 %v2223_v40, %v487_v14  ;;  %1769 = vmatmul.msk.f32.gmra.mxu3 %vm46_vm0, %v2416_v20  ;;  %v334_v26 = vadd.f32 %v333_v18, %v223_v62 }
 0x143   :  { %1818 = vmatmul.msk.f32.gmra.mxu0 %vm46_vm0, %v2370_v52 }
 0x144   :  { %v579_v23 = vmin.f32 %v519_v21, 0.0  ;;  %vm549_vm7 = vcmp.gt.f32.partialorder %v519_v21, 0.0 }
 0x145   :  { %v818_v27 = vpop.f32.mrf.mxu3 }
 0x146   :  { %v1958_v28 = vpop.eup %1957  ;;  %v631_v30 = vmul.f32 1.442695, %v579_v23 }
 0x147   :  { %v444_v31 = vpop.f32.mrf.mxu2  ;;  %v1741_v35 = vadd.f32 -1.0, %v1958_v28 }
 0x148   :  { %v488_v36 = vadd.f32 %v444_v31, %v334_v26  ;;  %v229_v37 = vpop.f32.mrf.mxu0  ;;  %1959 = vpow2.f32 %v631_v30 }
 0x149   :  { %v336_v41 = vpop.f32.mrf.mxu1  ;;  %v2423_v42 = vsel %vm548_vm6, %v518_v5, %v1741_v35 }
 0x14a   :  { %v520_v44 = vadd.f32 %v2223_v40, %v488_v36  ;;  %1770 = vmatmul.msk.f32.gmra.mxu3 %vm46_vm0, %v2423_v42  ;;  %v337_v46 = vadd.f32 %v336_v41, %v226_v17 }
 0x14b   :  { %1819 = vmatmul.msk.f32.gmra.mxu0 %vm46_vm0, %v2377_v0 }
 0x14c   :  { %v580_v45 = vmin.f32 %v520_v44, 0.0  ;;  %vm550_vm8 = vcmp.gt.f32.partialorder %v520_v44, 0.0 }
 0x14d   :  { %v2430_v48 = vpop.f32.mrf.mxu3 }
 0x14e   :  { %v1960_v49 = vpop.eup %1959  ;;  %v633_v51 = vmul.f32 1.442695, %v580_v45 }
 0x14f   :  { %v447_v53 = vpop.f32.mrf.mxu2  ;;  %v1742_v54 = vadd.f32 -1.0, %v1960_v49 }
 0x150   :  { %v489_v56 = vadd.f32 %v447_v53, %v337_v46  ;;  %v232_v57 = vpop.f32.mrf.mxu0  ;;  %1961 = vpow2.f32 %v633_v51 }
 0x151   :  { %v339_v58 = vpop.f32.mrf.mxu1  ;;  %v2432_v60 = vsel %vm549_vm7, %v519_v21, %v1742_v54 }
 0x152   :  { %v521_v61 = vadd.f32 %v2223_v40, %v489_v56  ;;  %1771 = vmatmul.msk.f32.gmra.mxu3 %vm46_vm0, %v2432_v60  ;;  %v340_v62 = vadd.f32 %v339_v58, %v229_v37 }
 0x153   :  { %1820 = vmatmul.msk.f32.gmra.mxu0 %vm46_vm0, %v2384_v16 }
 0x154   :  { %v581_v3 = vmin.f32 %v521_v61, 0.0  ;;  %vm551_vm9 = vcmp.gt.f32.partialorder %v521_v61, 0.0 }
 0x155   :  { %v823_v63 = vpop.f32.mrf.mxu3 }
 0x156   :  { %v1962_v5 = vpop.eup %1961  ;;  %v635_v7 = vmul.f32 1.442695, %v581_v3 }
 0x157   :  { %v450_v8 = vpop.f32.mrf.mxu2  ;;  %v1743_v11 = vadd.f32 -1.0, %v1962_v5 }
 0x158   :  { %v490_v2 = vadd.f32 %v450_v8, %v340_v62  ;;  %v235_v12 = vpop.f32.mrf.mxu0  ;;  %1963 = vpow2.f32 %v635_v7 }
 0x159   :  { %v342_v13 = vpop.f32.mrf.mxu1  ;;  %v2439_v14 = vsel %vm550_vm8, %v520_v44, %v1743_v11 }
 0x15a   :  { %v522_v17 = vadd.f32 %v2223_v40, %v490_v2  ;;  %1772 = vmatmul.msk.f32.gmra.mxu3 %vm46_vm0, %v2439_v14  ;;  %v343_v21 = vadd.f32 %v342_v13, %v232_v57 }
 0x15b   :  { %1821 = vmatmul.msk.f32.gmra.mxu0 %vm46_vm0, %v2391_v32 }
 0x15c   :  { %v582_v18 = vmin.f32 %v522_v17, 0.0  ;;  %vm552_vm10 = vcmp.gt.f32.partialorder %v522_v17, 0.0 }
 0x15d   :  { %v2446_v23 = vpop.f32.mrf.mxu3 }
 0x15e   :  { %v1964_v26 = vpop.eup %1963  ;;  %v637_v27 = vmul.f32 1.442695, %v582_v18 }
 0x15f   :  { %v453_v28 = vpop.f32.mrf.mxu2  ;;  %v1744_v30 = vadd.f32 -1.0, %v1964_v26 }
 0x160   :  { %1965 = vpow2.f32 %v637_v27  ;;  %v491_v31 = vadd.f32 %v453_v28, %v343_v21  ;;  %v2448_v35 = vpop.f32.mrf.mxu0 }
 0x161   :  { %v345_v36 = vpop.f32.mrf.mxu1  ;;  %v2450_v37 = vsel %vm551_vm9, %v521_v61, %v1744_v30 }
 0x162   :  { %v523_v41 = vadd.f32 %v2223_v40, %v491_v31  ;;  %1773 = vmatmul.msk.f32.gmra.mxu3 %vm46_vm0, %v2450_v37  ;;  %v346_v45 = vadd.f32 %v345_v36, %v235_v12  ;;  %v497_v12 = vadd.f32 %v2223_v40, %v2209_v33 }
 0x163   :  { %1822 = vmatmul.msk.f32.gmra.mxu0 %vm46_vm0, %v2400_v50 }
 0x164   :  { %v583_v44 = vmin.f32 %v523_v41, 0.0  ;;  %vm553_vm11 = vcmp.gt.f32.partialorder %v523_v41, 0.0  ;;  %vm527_vm14 = vcmp.gt.f32.partialorder %v497_v12, 0.0 }
 0x165   :  { %v828_v46 = vpop.f32.mrf.mxu3 }
 0x166   :  { %v1966_v49 = vpop.eup %1965  ;;  %v639_v51 = vmul.f32 1.442695, %v583_v44  ;;  %v1176_v44 = vld [vmem:[%s2803_s1 + $0x38] sm:$0xff] }
 0x167   :  { %v456_v53 = vpop.f32.mrf.mxu2  ;;  %v1745_v54 = vadd.f32 -1.0, %v1966_v49  ;;  %1228 = vmatpush.msra.mxu1 %v1176_v44 }
 0x168   :  { %1967 = vpow2.f32 %v639_v51  ;;  %v492_v56 = vadd.f32 %v456_v53, %v346_v45  ;;  %v994_v57 = vpop.f32.mrf.mxu0 }
 0x169   :  { %v2457_v58 = vsel %vm552_vm10, %v522_v17, %v1745_v54  ;;  %v348_v3 = vpop.f32.mrf.mxu1 }
 0x16a   :  { %v524_v61 = vadd.f32 %v2223_v40, %v492_v56  ;;  %1774 = vmatmul.msk.f32.gmra.mxu3 %vm46_vm0, %v2457_v58  ;;  %v349_v8 = vadd.f32 %v348_v3, %v2190_v24  ;;  %v557_v24 = vmin.f32 %v497_v12, 0.0 }
 0x16b   :  { %1823 = vmatmul.msk.f32.gmra.mxu0 %vm46_vm0, %v2407_v4 }
 0x16c   :  { %v584_v62 = vmin.f32 %v524_v61, 0.0  ;;  %v587_v31 = vmul.f32 1.442695, %v557_v24  ;;  %vm554_vm12 = vcmp.gt.f32.partialorder %v524_v61, 0.0 }
 0x16d   :  { %v2464_v63 = vpop.f32.mrf.mxu3 }
 0x16e   :  { %v1968_v5 = vpop.eup %1967  ;;  %v641_v7 = vmul.f32 1.442695, %v584_v62 }
 0x16f   :  { %v459_v11 = vpop.f32.mrf.mxu2  ;;  %v1746_v2 = vadd.f32 -1.0, %v1968_v5 }
 0x170   :  { %1969 = vpow2.f32 %v641_v7  ;;  %v493_v13 = vadd.f32 %v459_v11, %v349_v8  ;;  %v2469_v17 = vpop.f32.mrf.mxu0 }
 0x171   :  { %v2471_v18 = vsel %vm553_vm11, %v523_v41, %v1746_v2  ;;  %v351_v8 = vpop.f32.mrf.mxu1 }
 0x172   :  { %v525_v21 = vadd.f32 %v2223_v40, %v493_v13  ;;  %1775 = vmatmul.msk.f32.gmra.mxu3 %vm46_vm0, %v2471_v18 }
 0x173   :  { %1824 = vmatmul.msk.f32.gmra.mxu0 %vm46_vm0, %v2416_v20 }
 0x174   :  { %v585_v26 = vmin.f32 %v525_v21, 0.0  ;;  %vm555_vm13 = vcmp.gt.f32.partialorder %v525_v21, 0.0 }
 0x175   :  { %v833_v27 = vpop.f32.mrf.mxu3 }
 0x176   :  { %v1970_v28 = vpop.eup %1969  ;;  %v643_v33 = vmul.f32 1.442695, %v585_v26 }
 0x177   :  { %v1747_v30 = vadd.f32 -1.0, %v1970_v28  ;;  %v462_v2 = vpop.f32.mrf.mxu2 }
 0x178   :  { %1971 = vpow2.f32 %v643_v33  ;;  %v999_v36 = vpop.f32.mrf.mxu0 }
 0x179   :  { %v2478_v41 = vsel %vm554_vm12, %v524_v61, %v1747_v30  ;;  %1973 = vpow2.f32 %v587_v31 }
 0x17a   :  { %1776 = vmatmul.msk.f32.gmra.mxu3 %vm46_vm0, %v2478_v41 }
 0x17b   :  { %1825 = vmatmul.msk.f32.gmra.mxu0 %vm46_vm0, %v2423_v42 }
 0x17d   :  { %v2487_v45 = vpop.f32.mrf.mxu3 }
 0x17e   :  { %v1972_v46 = vpop.eup %1971 }
 0x17f   :  { %v1748_v49 = vadd.f32 -1.0, %v1972_v46  ;;  %v1974_v54 = vpop.eup %1973 }
 0x180   :  { %v2489_v51 = vpop.f32.mrf.mxu0  ;;  %v1720_v57 = vadd.f32 -1.0, %v1974_v54 }
 0x181   :  { %v705_v53 = vsel %vm555_vm13, %v525_v21, %v1748_v49 }
 0x182   :  { %1777 = vmatmul.msk.f32.gmra.mxu3 %vm46_vm0, %v705_v53  ;;  %v677_v3 = vsel %vm527_vm14, %v497_v12, %v1720_v57  ;;  %v352_v12 = vadd.f32 %v351_v8, %v2195_v25 }
 0x183   :  { %1826 = vmatmul.msk.f32.gmra.mxu0 %vm46_vm0, %v2432_v60 }
 0x184   :  { %v494_v13 = vadd.f32 %v462_v2, %v352_v12  ;;  %v2580_v12 = vld [vmem:[%s2803_s1 + $0x61] ss:$0 sm:$0xff] }
 0x185   :  { %v838_v56 = vpop.f32.mrf.mxu3 }
 0x188   :  { %v1004_v61 = vpop.f32.mrf.mxu0 }
 0x18a   :  { %1778 = vmatmul.msk.f32.vlgmr.msrb.gmra.mxu3 %vm46_vm0, %v677_v3 }
 0x18b   :  { %1827 = vmatmul.msk.f32.gmra.mxu0 %vm46_vm0, %v2439_v14 }
 0x18d   :  { %v2497_v62 = vpop.f32.mrf.mxu3 }
 0x190   :  { %v2499_v5 = vpop.f32.mrf.mxu0 }
 0x192   :  { %1779 = vmatmul.msk.f32.gmra.mxu3 %vm46_vm0, %v2242_v1  ;;  %v526_v1 = vadd.f32 %v2223_v40, %v494_v13 }
 0x193   :  { %1828 = vmatmul.msk.f32.gmra.mxu0 %vm46_vm0, %v2450_v37 }
 0x194   :  { %v586_v26 = vmin.f32 %v526_v1, 0.0  ;;  %vm556_vm15 = vcmp.gt.f32.partialorder %v526_v1, 0.0 }
 0x195   :  { %v843_v7 = vpop.f32.mrf.mxu3 }
 0x196   :  { %v645_v25 = vmul.f32 1.442695, %v586_v26 }
 0x198   :  { %v1009_v11 = vpop.f32.mrf.mxu0  ;;  %1975 = vpow2.f32 %v645_v25 }
 0x19a   :  { %1780 = vmatmul.msk.f32.gmra.mxu3 %vm46_vm0, %v2253_v15 }
 0x19b   :  { %1829 = vmatmul.msk.f32.gmra.mxu0 %vm46_vm0, %v2457_v58 }
 0x19d   :  { %v2510_v21 = vpop.f32.mrf.mxu3 }
 0x1a0   :  { %v2512_v24 = vpop.f32.mrf.mxu0 }
 0x1a2   :  { %1781 = vmatmul.msk.f32.gmra.mxu3 %vm46_vm0, %v2264_v29  ;;  %v1976_v29 = vpop.eup %1975 }
 0x1a3   :  { %1830 = vmatmul.msk.f32.gmra.mxu0 %vm46_vm0, %v2471_v18  ;;  %v1749_v30 = vadd.f32 -1.0, %v1976_v29 }
 0x1a5   :  { %v848_v15 = vpop.f32.mrf.mxu3 }
 0x1a8   :  { %v1014_v27 = vpop.f32.mrf.mxu0 }
 0x1aa   :  { %1782 = vmatmul.msk.f32.gmra.mxu3 %vm46_vm0, %v2275_v43  ;;  %v706_v43 = vsel %vm556_vm15, %v526_v1, %v1749_v30 }
 0x1ab   :  { %1831 = vmatmul.msk.f32.gmra.mxu0 %vm46_vm0, %v2478_v41 }
 0x1ad   :  { %v2523_v28 = vpop.f32.mrf.mxu3 }
 0x1b0   :  { %v2525_v40 = vpop.f32.mrf.mxu0 }
 0x1b2   :  { %1783 = vmatmul.msk.f32.gmra.mxu3 %vm46_vm0, %v2286_v55 }
 0x1b3   :  { %1832 = vmatmul.msk.f32.gmra.mxu0 %vm46_vm0, %v705_v53 }
 0x1b5   :  { %v853_v33 = vpop.f32.mrf.mxu3 }
 0x1b8   :  { %v1019_v31 = vpop.f32.mrf.mxu0 }
 0x1ba   :  { %1784 = vmatmul.msk.f32.gmra.mxu3 %vm46_vm0, %v2297_v6  ;;  %v1175_v6 = vld [vmem:[%s2803_s1 + $0x30] sm:$0xff] }
 0x1bb   :  { %1833 = vmatmul.msk.f32.gmra.mxu0 %vm46_vm0, %v706_v43  ;;  %1278 = vmatpush.msra.mxu2 %v1175_v6 }
 0x1bd   :  { %v2533_v36 = vpop.f32.mrf.mxu3 }
 0x1c0   :  { %v2535_v44 = vpop.f32.mrf.mxu0 }
 0x1c2   :  { %1785 = vmatmul.msk.f32.gmra.mxu3 %vm46_vm0, %v2308_v19 }
 0x1c5   :  { %v858_v55 = vpop.f32.mrf.mxu3 }
 0x1c8   :  { %v1024_v46 = vpop.f32.mrf.mxu0 }
 0x1ca   :  { %1786 = vmatmul.msk.f32.gmra.mxu3 %vm46_vm0, %v2316_v34 }
 0x1cd   :  { %v2541_v49 = vpop.f32.mrf.mxu3 }
 0x1d0   :  { %v2543_v53 = vpop.f32.mrf.mxu0 }
 0x1d2   :  { %1787 = vmatmul.msk.f32.gmra.mxu3 %vm46_vm0, %v2326_v47 }
 0x1d5   :  { %v863_v54 = vpop.f32.mrf.mxu3 }
 0x1d8   :  { %v1029_v56 = vpop.f32.mrf.mxu0 }
 0x1da   :  { %1788 = vmatmul.msk.f32.gmra.mxu3 %vm46_vm0, %v2336_v59 }
 0x1dd   :  { %v2552_v19 = vpop.f32.mrf.mxu3 }
 0x1e0   :  { %v2554_v34 = vpop.f32.mrf.mxu0 }
 0x1e2   :  { %1789 = vmatmul.msk.f32.gmra.mxu3 %vm46_vm0, %v2349_v10 }
 0x1e5   :  { %v868_v57 = vpop.f32.mrf.mxu3 }
 0x1e8   :  { %v1034_v61 = vpop.f32.mrf.mxu0 }
 0x1ea   :  { %1790 = vmatmul.msk.f32.gmra.mxu3 %vm46_vm0, %v2356_v22 }
 0x1ed   :  { %v2560_v47 = vpop.f32.mrf.mxu3 }
 0x1f0   :  { %v2562_v3 = vpop.f32.mrf.mxu0 }
 0x1f2   :  { %1791 = vmatmul.msk.f32.gmra.mxu3 %vm46_vm0, %v2363_v38 }
 0x1f5   :  { %v873_v59 = vpop.f32.mrf.mxu3 }
 0x1f8   :  { %v1039_v7 = vpop.f32.mrf.mxu0 }
 0x1fa   :  { %1792 = vmatmul.msk.f32.gmra.mxu3 %vm46_vm0, %v2370_v52 }
 0x1fd   :  { %v2568_v8 = vpop.f32.mrf.mxu3 }
 0x200   :  { %v2570_v10 = vpop.f32.mrf.mxu0 }
 0x202   :  { %1793 = vmatmul.msk.f32.gmra.mxu3 %vm46_vm0, %v2377_v0 }
 0x205   :  { %v878_v22 = vpop.f32.mrf.mxu3 }
 0x208   :  { %v1044_v11 = vpop.f32.mrf.mxu0 }
 0x20a   :  { %1794 = vmatmul.msk.f32.gmra.mxu3 %vm46_vm0, %v2384_v16 }
 0x20d   :  { %v900_v2 = vpop.f32.mrf.mxu3 }
 0x20e   :  { %v901_v38 = vadd.f32 %v900_v2, %v2398_v39 }
 0x210   :  { %v1061_v52 = vadd.f32 %v2448_v35, %v901_v38  ;;  %v2583_v13 = vpop.f32.mrf.mxu0 }
 0x212   :  { %v1077_v1 = vadd.f32 %v2580_v12, %v1061_v52  ;;  %1795 = vmatmul.msk.f32.gmra.mxu3 %vm46_vm0, %v2391_v32 }
 0x214   :  { %v1105_v0 = vmin.f32 %v1077_v1, 0.0  ;;  %vm1091_vm1 = vcmp.gt.f32.partialorder %v1077_v1, 0.0 }
 0x215   :  { %v903_v26 = vpop.f32.mrf.mxu3 }
 0x216   :  { %v1119_v16 = vmul.f32 1.442695, %v1105_v0 }
 0x218   :  { %1977 = vpow2.f32 %v1119_v16  ;;  %v1049_v15 = vpop.f32.mrf.mxu0 }
 0x21a   :  { %1796 = vmatmul.msk.f32.gmra.mxu3 %vm46_vm0, %v2400_v50 }
 0x21d   :  { %v905_v39 = vpop.f32.mrf.mxu3 }
 0x21e   :  { %v1978_v27 = vpop.eup %1977  ;;  %v906_v25 = vadd.f32 %v905_v39, %v2414_v9 }
 0x21f   :  { %v1834_v35 = vadd.f32 -1.0, %v1978_v27 }
 0x220   :  { %v1062_v29 = vadd.f32 %v2469_v17, %v906_v25  ;;  %v2592_v33 = vpop.f32.mrf.mxu0 }
 0x221   :  { %v1161_v30 = vsel %vm1091_vm1, %v1077_v1, %v1834_v35 }
 0x222   :  { %v1078_v32 = vadd.f32 %v2580_v12, %v1062_v29  ;;  %1797 = vmatmul.msk.f32.gmra.mxu3 %vm46_vm0, %v2407_v4  ;;  %1860 = vmatmul.msk.f32.vlgmr.msra.gmra.mxu2 %vm46_vm0, %v1161_v30 }
 0x224   :  { %v1106_v31 = vmin.f32 %v1078_v32, 0.0  ;;  %vm1092_vm2 = vcmp.gt.f32.partialorder %v1078_v32, 0.0 }
 0x225   :  { %v908_v50 = vpop.f32.mrf.mxu3 }
 0x226   :  { %v1121_v43 = vmul.f32 1.442695, %v1106_v31 }
 0x228   :  { %1979 = vpow2.f32 %v1121_v43  ;;  %v1054_v55 = vpop.f32.mrf.mxu0 }
 0x22a   :  { %1798 = vmatmul.msk.f32.gmra.mxu3 %vm46_vm0, %v2416_v20 }
 0x22d   :  { %v910_v9 = vpop.f32.mrf.mxu3 }
 0x22e   :  { %v1980_v17 = vpop.eup %1979  ;;  %v911_v46 = vadd.f32 %v910_v9, %v2430_v48 }
 0x22f   :  { %v1835_v6 = vadd.f32 -1.0, %v1980_v17 }
 0x230   :  { %v1063_v54 = vadd.f32 %v2489_v51, %v911_v46  ;;  %v2602_v56 = vpop.f32.mrf.mxu0 }
 0x231   :  { %v1162_v4 = vsel %vm1092_vm2, %v1078_v32, %v1835_v6 }
 0x232   :  { %v1079_v57 = vadd.f32 %v2580_v12, %v1063_v54  ;;  %1799 = vmatmul.msk.f32.gmra.mxu3 %vm46_vm0, %v2423_v42  ;;  %1848 = vmatmul.msk.f32.vlgmr.msra.gmra.mxu1 %vm46_vm0, %v1162_v4 }
 0x233   :  { %1861 = vmatmul.msk.f32.gmra.mxu2 %vm46_vm0, %v1162_v4 }
 0x234   :  { %v1107_v20 = vmin.f32 %v1079_v57, 0.0  ;;  %vm1093_vm3 = vcmp.gt.f32.partialorder %v1079_v57, 0.0 }
 0x235   :  { %v913_v61 = vpop.f32.mrf.mxu3 }
 0x236   :  { %v1123_v59 = vmul.f32 1.442695, %v1107_v20 }
 0x238   :  { %v1059_v48 = vpop.f32.mrf.mxu0  ;;  %1981 = vpow2.f32 %v1123_v59 }
 0x23a   :  { %1800 = vmatmul.msk.f32.gmra.mxu3 %vm46_vm0, %v2432_v60 }
 0x23d   :  { %v915_v51 = vpop.f32.mrf.mxu3 }
 0x23e   :  { %v1982_v7 = vpop.eup %1981  ;;  %v916_v22 = vadd.f32 %v915_v51, %v2446_v23 }
 0x23f   :  { %v1836_v11 = vadd.f32 -1.0, %v1982_v7 }
 0x240   :  { %v1064_v2 = vadd.f32 %v2499_v5, %v916_v22 }
 0x241   :  { %v2613_v42 = vsel %vm1093_vm3, %v1079_v57, %v1836_v11 }
 0x242   :  { %v1080_v38 = vadd.f32 %v2580_v12, %v1064_v2  ;;  %1801 = vmatmul.msk.f32.gmra.mxu3 %vm46_vm0, %v2439_v14  ;;  %1849 = vmatmul.msk.f32.gmra.mxu1 %vm46_vm0, %v2613_v42 }
 0x243   :  { %1862 = vmatmul.msk.f32.gmra.mxu2 %vm46_vm0, %v2613_v42 }
 0x244   :  { %v1108_v60 = vmin.f32 %v1080_v38, 0.0  ;;  %vm1094_vm4 = vcmp.gt.f32.partialorder %v1080_v38, 0.0 }
 0x245   :  { %v918_v52 = vpop.f32.mrf.mxu3 }
 0x246   :  { %v1125_v23 = vmul.f32 1.442695, %v1108_v60 }
 0x248   :  { %1983 = vpow2.f32 %v1125_v23 }
 0x24a   :  { %1802 = vmatmul.msk.f32.gmra.mxu3 %vm46_vm0, %v2450_v37 }
 0x24d   :  { %v920_v5 = vpop.f32.mrf.mxu3 }
 0x24e   :  { %v1984_v1 = vpop.eup %1983  ;;  %v921_v0 = vadd.f32 %v920_v5, %v2464_v63 }
 0x24f   :  { %v1837_v26 = vadd.f32 -1.0, %v1984_v1 }
 0x250   :  { %v1065_v14 = vadd.f32 %v2512_v24, %v921_v0 }
 0x251   :  { %v2626_v16 = vsel %vm1094_vm4, %v1080_v38, %v1837_v26 }
 0x252   :  { %v1081_v15 = vadd.f32 %v2580_v12, %v1065_v14  ;;  %1803 = vmatmul.msk.f32.gmra.mxu3 %vm46_vm0, %v2457_v58  ;;  %1850 = vmatmul.msk.f32.gmra.mxu1 %vm46_vm0, %v2626_v16 }
 0x253   :  { %1863 = vmatmul.msk.f32.gmra.mxu2 %vm46_vm0, %v2626_v16 }
 0x254   :  { %v1109_v37 = vmin.f32 %v1081_v15, 0.0  ;;  %vm1095_vm5 = vcmp.gt.f32.partialorder %v1081_v15, 0.0 }
 0x255   :  { %v923_v39 = vpop.f32.mrf.mxu3 }
 0x256   :  { %v1127_v63 = vmul.f32 1.442695, %v1109_v37 }
 0x258   :  { %1985 = vpow2.f32 %v1127_v63 }
 0x25a   :  { %1804 = vmatmul.msk.f32.gmra.mxu3 %vm46_vm0, %v2471_v18 }
 0x25d   :  { %v925_v24 = vpop.f32.mrf.mxu3 }
 0x25e   :  { %v1986_v27 = vpop.eup %1985  ;;  %v926_v25 = vadd.f32 %v925_v24, %v2487_v45 }
 0x25f   :  { %v1838_v35 = vadd.f32 -1.0, %v1986_v27 }
 0x260   :  { %v1066_v58 = vadd.f32 %v2525_v40, %v926_v25  ;;  %v1310_v40 = vld [vmem:[%s2803_s1 + $0x40] sm:$0xff] }
 0x261   :  { %v2639_v29 = vsel %vm1095_vm5, %v1081_v15, %v1838_v35  ;;  %1329 = vmatpush.msrb.mxu1 %v1310_v40 }
 0x262   :  { %v1082_v30 = vadd.f32 %v2580_v12, %v1066_v58  ;;  %1805 = vmatmul.msk.f32.gmra.mxu3 %vm46_vm0, %v2478_v41  ;;  %1851 = vmatmul.msk.f32.gmra.mxu1 %vm46_vm0, %v2639_v29 }
 0x263   :  { %1864 = vmatmul.msk.f32.gmra.mxu2 %vm46_vm0, %v2639_v29 }
 0x264   :  { %v1110_v18 = vmin.f32 %v1082_v30, 0.0  ;;  %vm1096_vm6 = vcmp.gt.f32.partialorder %v1082_v30, 0.0 }
 0x265   :  { %v928_v32 = vpop.f32.mrf.mxu3 }
 0x266   :  { %v1129_v45 = vmul.f32 1.442695, %v1110_v18 }
 0x268   :  { %1987 = vpow2.f32 %v1129_v45 }
 0x26d   :  { %v930_v31 = vpop.f32.mrf.mxu3 }
 0x26e   :  { %v1988_v50 = vpop.eup %1987  ;;  %v931_v43 = vadd.f32 %v930_v31, %v2497_v62 }
 0x26f   :  { %v1839_v41 = vadd.f32 -1.0, %v1988_v50 }
 0x270   :  { %v1067_v55 = vadd.f32 %v2535_v44, %v931_v43 }
 0x271   :  { %v2653_v9 = vsel %vm1096_vm6, %v1082_v30, %v1839_v41 }
 0x272   :  { %v1083_v17 = vadd.f32 %v2580_v12, %v1067_v55  ;;  %1852 = vmatmul.msk.f32.gmra.mxu1 %vm46_vm0, %v2653_v9  ;;  %1865 = vmatmul.msk.f32.gmra.mxu2 %vm46_vm0, %v2653_v9 }
 0x274   :  { %v1111_v46 = vmin.f32 %v1083_v17, 0.0  ;;  %vm1097_vm7 = vcmp.gt.f32.partialorder %v1083_v17, 0.0 }
 0x275   :  { %v933_v6 = vpop.f32.mrf.mxu3 }
 0x276   :  { %v1131_v54 = vmul.f32 1.442695, %v1111_v46 }
 0x278   :  { %1989 = vpow2.f32 %v1131_v54 }
 0x27d   :  { %v935_v4 = vpop.f32.mrf.mxu3 }
 0x27e   :  { %v1990_v62 = vpop.eup %1989  ;;  %v936_v57 = vadd.f32 %v935_v4, %v2510_v21 }
 0x27f   :  { %v1840_v44 = vadd.f32 -1.0, %v1990_v62 }
 0x280   :  { %v1068_v20 = vadd.f32 %v2543_v53, %v936_v57 }
 0x281   :  { %v2662_v61 = vsel %vm1097_vm7, %v1083_v17, %v1840_v44 }
 0x282   :  { %v1084_v59 = vadd.f32 %v2580_v12, %v1068_v20  ;;  %1853 = vmatmul.msk.f32.gmra.mxu1 %vm46_vm0, %v2662_v61  ;;  %1866 = vmatmul.msk.f32.gmra.mxu2 %vm46_vm0, %v2662_v61 }
 0x284   :  { %v1112_v48 = vmin.f32 %v1084_v59, 0.0  ;;  %vm1098_vm8 = vcmp.gt.f32.partialorder %v1084_v59, 0.0 }
 0x285   :  { %v938_v51 = vpop.f32.mrf.mxu3 }
 0x286   :  { %v1133_v7 = vmul.f32 1.442695, %v1112_v48 }
 0x288   :  { %1991 = vpow2.f32 %v1133_v7 }
 0x28d   :  { %v940_v22 = vpop.f32.mrf.mxu3 }
 0x28e   :  { %v1992_v21 = vpop.eup %1991  ;;  %v941_v11 = vadd.f32 %v940_v22, %v2523_v28 }
 0x28f   :  { %v1841_v53 = vadd.f32 -1.0, %v1992_v21 }
 0x290   :  { %v1069_v2 = vadd.f32 %v2554_v34, %v941_v11 }
 0x291   :  { %v2671_v38 = vsel %vm1098_vm8, %v1084_v59, %v1841_v53 }
 0x292   :  { %v1085_v60 = vadd.f32 %v2580_v12, %v1069_v2  ;;  %1854 = vmatmul.msk.f32.gmra.mxu1 %vm46_vm0, %v2671_v38  ;;  %1867 = vmatmul.msk.f32.gmra.mxu2 %vm46_vm0, %v2671_v38 }
 0x294   :  { %v1113_v52 = vmin.f32 %v1085_v60, 0.0  ;;  %vm1099_vm9 = vcmp.gt.f32.partialorder %v1085_v60, 0.0 }
 0x295   :  { %v943_v23 = vpop.f32.mrf.mxu3 }
 0x296   :  { %v1135_v5 = vmul.f32 1.442695, %v1113_v52 }
 0x298   :  { %1993 = vpow2.f32 %v1135_v5 }
 0x29d   :  { %v945_v1 = vpop.f32.mrf.mxu3 }
 0x29e   :  { %v1994_v28 = vpop.eup %1993  ;;  %v946_v0 = vadd.f32 %v945_v1, %v2533_v36 }
 0x29f   :  { %v1842_v34 = vadd.f32 -1.0, %v1994_v28 }
 0x2a0   :  { %v1070_v26 = vadd.f32 %v2562_v3, %v946_v0 }
 0x2a1   :  { %v2680_v14 = vsel %vm1099_vm9, %v1085_v60, %v1842_v34 }
 0x2a2   :  { %v1086_v15 = vadd.f32 %v2580_v12, %v1070_v26  ;;  %1855 = vmatmul.msk.f32.gmra.mxu1 %vm46_vm0, %v2680_v14  ;;  %1868 = vmatmul.msk.f32.gmra.mxu2 %vm46_vm0, %v2680_v14 }
 0x2a4   :  { %v1114_v37 = vmin.f32 %v1086_v15, 0.0  ;;  %vm1100_vm10 = vcmp.gt.f32.partialorder %v1086_v15, 0.0 }
 0x2a5   :  { %v948_v39 = vpop.f32.mrf.mxu3  ;;  %v2687_v27 = vpop.f32.mrf.mxu2 }
 0x2a6   :  { %v1137_v63 = vmul.f32 1.442695, %v1114_v37 }
 0x2a8   :  { %1995 = vpow2.f32 %v1137_v63 }
 0x2ad   :  { %v950_v24 = vpop.f32.mrf.mxu3 }
 0x2ae   :  { %v1996_v36 = vpop.eup %1995  ;;  %v951_v3 = vadd.f32 %v950_v24, %v2541_v49 }
 0x2af   :  { %v1843_v25 = vadd.f32 -1.0, %v1996_v36  ;;  %v2698_v31 = vpop.f32.mrf.mxu1 }
 0x2b0   :  { %v1071_v35 = vadd.f32 %v2570_v10, %v951_v3 }
 0x2b1   :  { %v2691_v58 = vsel %vm1100_vm10, %v1086_v15, %v1843_v25  ;;  %vm1589_vm10 = vcmask 261120  }
 0x2b2   :  { %v1087_v30 = vadd.f32 %v2580_v12, %v1071_v35  ;;  %1856 = vmatmul.msk.f32.gmra.mxu1 %vm46_vm0, %v2691_v58  ;;  %1869 = vmatmul.msk.f32.gmra.mxu2 %vm46_vm0, %v2691_v58 }
 0x2b4   :  { %v1115_v18 = vmin.f32 %v1087_v30, 0.0  ;;  %vm1101_vm11 = vcmp.gt.f32.partialorder %v1087_v30, 0.0 }
 0x2b5   :  { %v953_v32 = vpop.f32.mrf.mxu3 }
 0x2b6   :  { %v1139_v45 = vmul.f32 1.442695, %v1115_v18  ;;  %v1283_v40 = vpop.f32.mrf.mxu2 }
 0x2b8   :  { %1997 = vpow2.f32 %v1139_v45 }
 0x2bd   :  { %v955_v49 = vpop.f32.mrf.mxu3 }
 0x2be   :  { %v1998_v10 = vpop.eup %1997  ;;  %v956_v50 = vadd.f32 %v955_v49, %v2552_v19 }
 0x2bf   :  { %v1233_v43 = vpop.f32.mrf.mxu1  ;;  %v1844_v41 = vadd.f32 -1.0, %v1998_v10  ;;  %v2744_v10 = vld [vmem:[%s2803_s1 + $0x62] ss:$0 sm:$0xff] }
 0x2c0   :  { %v1072_v55 = vadd.f32 %v2583_v13, %v956_v50 }
 0x2c1   :  { %v1171_v17 = vsel %vm1101_vm11, %v1087_v30, %v1844_v41 }
 0x2c2   :  { %v1088_v46 = vadd.f32 %v2580_v12, %v1072_v55  ;;  %1857 = vmatmul.msk.f32.gmra.mxu1 %vm46_vm0, %v1171_v17  ;;  %1870 = vmatmul.msk.f32.gmra.mxu2 %vm46_vm0, %v1171_v17 }
 0x2c4   :  { %v1116_v6 = vmin.f32 %v1088_v46, 0.0  ;;  %vm1102_vm12 = vcmp.gt.f32.partialorder %v1088_v46, 0.0 }
 0x2c5   :  { %v958_v54 = vpop.f32.mrf.mxu3 }
 0x2c6   :  { %v1141_v4 = vmul.f32 1.442695, %v1116_v6  ;;  %v1285_v44 = vpop.f32.mrf.mxu2 }
 0x2c8   :  { %1999 = vpow2.f32 %v1141_v4 }
 0x2cd   :  { %v960_v62 = vpop.f32.mrf.mxu3 }
 0x2ce   :  { %v2000_v57 = vpop.eup %1999  ;;  %v961_v19 = vadd.f32 %v960_v62, %v2560_v47 }
 0x2cf   :  { %v1235_v20 = vpop.f32.mrf.mxu1  ;;  %v1845_v59 = vadd.f32 -1.0, %v2000_v57 }
 0x2d0   :  { %v1073_v13 = vadd.f32 %v2592_v33, %v961_v19  ;;  %v2707_v48 = vadd.f32 %v1285_v44, %v1235_v20 }
 0x2d1   :  { %v1172_v51 = vsel %vm1102_vm12, %v1088_v46, %v1845_v59  ;;  %v1411_v46 = vld [vmem:[%s2803_s1 + $0x48] sm:$0xff] }
 0x2d2   :  { %v1089_v7 = vadd.f32 %v2580_v12, %v1073_v13  ;;  %1858 = vmatmul.msk.f32.gmra.mxu1 %vm46_vm0, %v1172_v51  ;;  %1871 = vmatmul.msk.f32.gmra.mxu2 %vm46_vm0, %v1172_v51 }
 0x2d4   :  { %v1117_v22 = vmin.f32 %v1089_v7, 0.0  ;;  %vm1103_vm13 = vcmp.gt.f32.partialorder %v1089_v7, 0.0 }
 0x2d5   :  { %v963_v21 = vpop.f32.mrf.mxu3 }
 0x2d6   :  { %v1143_v11 = vmul.f32 1.442695, %v1117_v22  ;;  %v1288_v53 = vpop.f32.mrf.mxu2 }
 0x2d8   :  { %2001 = vpow2.f32 %v1143_v11 }
 0x2dd   :  { %v965_v47 = vpop.f32.mrf.mxu3 }
 0x2de   :  { %v2002_v2 = vpop.eup %2001 }
 0x2df   :  { %v1238_v60 = vpop.f32.mrf.mxu1  ;;  %v1846_v52 = vadd.f32 -1.0, %v2002_v2  ;;  %v1281_v2 = vadd.f32 %v2687_v27, %v2698_v31 }
 0x2e0   :  { %v1486_v60 = vld [vmem:[%s2803_s1 + $0x58] sm:$0xff] }
 0x2e1   :  { %v1173_v33 = vsel %vm1103_vm13, %v1089_v7, %v1846_v52 }
 0x2e2   :  { %1859 = vmatmul.msk.f32.gmra.mxu1 %vm46_vm0, %v1173_v33 }
 0x2e5   :  { %v968_v23 = vpop.f32.mrf.mxu3 }
 0x2e6   :  { %v1290_v5 = vpop.f32.mrf.mxu2 }
 0x2ea   :  { %1872 = vmatmul.msk.f32.vlgmr.msrb.gmra.mxu1 %vm46_vm0, %v2613_v42 }
 0x2ef   :  { %v1240_v1 = vpop.f32.mrf.mxu1 }
 0x2f0   :  { %v1291_v28 = vadd.f32 %v1290_v5, %v1240_v1 }
 0x2f2   :  { %1873 = vmatmul.msk.f32.gmra.mxu1 %vm46_vm0, %v2626_v16 }
 0x2f5   :  { %v1293_v0 = vpop.f32.mrf.mxu2 }
 0x2fa   :  { %1874 = vmatmul.msk.f32.gmra.mxu1 %vm46_vm0, %v2639_v29  ;;  %v966_v29 = vadd.f32 %v965_v47, %v2568_v8 }
 0x2ff   :  { %v1243_v34 = vpop.f32.mrf.mxu1 }
 0x302   :  { %1875 = vmatmul.msk.f32.gmra.mxu1 %vm46_vm0, %v2653_v9  ;;  %v1412_v9 = vld [vmem:[%s2803_s1 + $0x50] sm:$0xff] }
 0x303   :  { %1440 = vmatpush.msrb.mxu2 %v1412_v9 }
 0x305   :  { %v1295_v26 = vpop.f32.mrf.mxu2  ;;  %1472 = vmatpush.msra.mxu2 %v1411_v46 }
 0x30a   :  { %1876 = vmatmul.msk.f32.gmra.mxu1 %vm46_vm0, %v2662_v61  ;;  %v1074_v61 = vadd.f32 %v2602_v56, %v966_v29 }
 0x30c   :  { %v1090_v39 = vadd.f32 %v2580_v12, %v1074_v61 }
 0x30e   :  { %vm1104_vm14 = vcmp.gt.f32.partialorder %v1090_v39, 0.0 }
 0x30f   :  { %v1245_v15 = vpop.f32.mrf.mxu1 }
 0x310   :  { %v1296_v42 = vadd.f32 %v1295_v26, %v1245_v15 }
 0x312   :  { %1877 = vmatmul.msk.f32.gmra.mxu1 %vm46_vm0, %v2671_v38  ;;  %v1118_v38 = vmin.f32 %v1090_v39, 0.0 }
 0x314   :  { %v1145_v24 = vmul.f32 1.442695, %v1118_v38 }
 0x315   :  { %v1298_v37 = vpop.f32.mrf.mxu2 }
 0x316   :  { %2003 = vpow2.f32 %v1145_v24 }
 0x31a   :  { %1878 = vmatmul.msk.f32.gmra.mxu1 %vm46_vm0, %v2680_v14 }
 0x31c   :  { %v2004_v3 = vpop.eup %2003 }
 0x31d   :  { %v1847_v25 = vadd.f32 -1.0, %v2004_v3 }
 0x31f   :  { %v1248_v16 = vpop.f32.mrf.mxu1  ;;  %v1174_v56 = vsel %vm1104_vm14, %v1090_v39, %v1847_v25 }
 0x322   :  { %1879 = vmatmul.msk.f32.gmra.mxu1 %vm46_vm0, %v2691_v58 }
 0x325   :  { %v1300_v63 = vpop.f32.mrf.mxu2 }
 0x32a   :  { %1880 = vmatmul.msk.f32.gmra.mxu1 %vm46_vm0, %v1171_v17 }
 0x32f   :  { %v1250_v14 = vpop.f32.mrf.mxu1 }
 0x330   :  { %v1301_v36 = vadd.f32 %v1300_v63, %v1250_v14 }
 0x332   :  { %1881 = vmatmul.msk.f32.gmra.mxu1 %vm46_vm0, %v1172_v51 }
 0x335   :  { %v1303_v8 = vpop.f32.mrf.mxu2 }
 0x33a   :  { %1882 = vmatmul.msk.f32.gmra.mxu1 %vm46_vm0, %v1173_v33 }
 0x33f   :  { %v1253_v35 = vpop.f32.mrf.mxu1 }
 0x342   :  { %1883 = vmatmul.msk.f32.gmra.mxu1 %vm46_vm0, %v1174_v56  ;;  %v1556_v56 = vld [vmem:[%s2803_s1 + $0x68] sm:$0xff] }
 0x343   :  { %1577 = vmatpush.msra.mxu1 %v1556_v56 }
 0x345   :  { %v1305_v12 = vpop.f32.mrf.mxu2 }
 0x34f   :  { %v1255_v58 = vpop.f32.mrf.mxu1 }
 0x350   :  { %v2739_v30 = vadd.f32 %v1305_v12, %v1255_v58 }
 0x355   :  { %v1308_v18 = vpop.f32.mrf.mxu2 }
 0x35f   :  { %v1258_v32 = vpop.f32.mrf.mxu1 }
 0x367   :  { %v1331_v45 = vpop.f32.mrf.mxu1 }
 0x368   :  { %v1361_v52 = vadd.f32 %v1331_v45, %v1281_v2 }
 0x36a   :  { %v1369_v1 = vadd.f32 %v2744_v10, %v1361_v52 }
 0x36c   :  { %v1381_v26 = vmin.f32 %v1369_v1, 0.0  ;;  %vm1375_vm4 = vcmp.gt.f32.partialorder %v1369_v1, 0.0 }
 0x36f   :  { %v1334_v40 = vpop.f32.mrf.mxu1 }
 0x377   :  { %v1336_v49 = vpop.f32.mrf.mxu1 }
 0x378   :  { %v1362_v50 = vadd.f32 %v1336_v49, %v2707_v48 }
 0x37a   :  { %v1370_v43 = vadd.f32 %v2744_v10, %v1362_v50  ;;  %v1914_v50 = vld [vmem:[%s2803_s1 + $0x63] ss:$0 sm:$0xff] }
 0x37c   :  { %v1382_v41 = vmin.f32 %v1370_v43, 0.0  ;;  %vm1376_vm15 = vcmp.gt.f32.partialorder %v1370_v43, 0.0 }
 0x37e   :  { %v1389_v55 = vmul.f32 1.442695, %v1382_v41 }
 0x37f   :  { %v1339_v17 = vpop.f32.mrf.mxu1 }
 0x380   :  { %2005 = vpow2.f32 %v1389_v55 }
 0x386   :  { %v2006_v6 = vpop.eup %2005 }
 0x387   :  { %v1885_v54 = vadd.f32 -1.0, %v2006_v6  ;;  %v1341_v4 = vpop.f32.mrf.mxu1 }
 0x388   :  { %v1363_v62 = vadd.f32 %v1341_v4, %v1291_v28 }
 0x389   :  { %v1406_v57 = vsel %vm1376_vm15, %v1370_v43, %v1885_v54 }
 0x38a   :  { %v1371_v44 = vadd.f32 %v2744_v10, %v1363_v62  ;;  %1890 = vmatmul.msk.f32.vlgmr.msrb.gmra.mxu2 %vm46_vm0, %v1406_v57 }
 0x38b   :  { %1505 = vmatpush.msrb.mxu2 %v1486_v60 }
 0x38c   :  { %v1383_v19 = vmin.f32 %v1371_v44, 0.0  ;;  %vm1377_vm1 = vcmp.gt.f32.partialorder %v1371_v44, 0.0 }
 0x38e   :  { %v1391_v20 = vmul.f32 1.442695, %v1383_v19  ;;  %v1585_v19 = vld [vmem:[%s2803_s1 + $0x88] sm:$0xff] }
 0x38f   :  { %v1344_v59 = vpop.f32.mrf.mxu1 }
 0x390   :  { %2007 = vpow2.f32 %v1391_v20 }
 0x396   :  { %v2008_v13 = vpop.eup %2007 }
 0x397   :  { %v1346_v48 = vpop.f32.mrf.mxu1  ;;  %v1886_v51 = vadd.f32 -1.0, %v2008_v13  ;;  %v1584_v13 = vld [vmem:[%s2803_s1 + $0x80] sm:$0xff] }
 0x398   :  { %v1364_v7 = vadd.f32 %v1346_v48, %v1296_v42  ;;  %v1387_v42 = vmul.f32 1.442695, %v1381_v26 }
 0x399   :  { %v1407_v22 = vsel %vm1377_vm1, %v1371_v44, %v1886_v51  ;;  %v1586_v44 = vld [vmem:[%s2803_s1 + $0x90] sm:$0xff] }
 0x39a   :  { %v1372_v21 = vadd.f32 %v2744_v10, %v1364_v7  ;;  %1891 = vmatmul.msk.f32.gmra.mxu2 %vm46_vm0, %v1407_v22  ;;  %v1583_v7 = vld [vmem:[%s2803_s1 + $0x78] sm:$0xff] }
 0x39c   :  { %v1384_v11 = vmin.f32 %v1372_v21, 0.0  ;;  %vm1378_vm2 = vcmp.gt.f32.partialorder %v1372_v21, 0.0 }
 0x39e   :  { %v1393_v53 = vmul.f32 1.442695, %v1384_v11 }
 0x39f   :  { %v1349_v47 = vpop.f32.mrf.mxu1 }
 0x3a0   :  { %2009 = vpow2.f32 %v1393_v53 }
 0x3a6   :  { %v2010_v33 = vpop.eup %2009 }
 0x3a7   :  { %v1351_v23 = vpop.f32.mrf.mxu1  ;;  %v1887_v5 = vadd.f32 -1.0, %v2010_v33 }
 0x3a8   :  { %v1365_v28 = vadd.f32 %v1351_v23, %v1301_v36 }
 0x3a9   :  { %v1408_v0 = vsel %vm1378_vm2, %v1372_v21, %v1887_v5 }
 0x3aa   :  { %v1373_v34 = vadd.f32 %v2744_v10, %v1365_v28  ;;  %1892 = vmatmul.msk.f32.gmra.mxu2 %vm46_vm0, %v1408_v0 }
 0x3ac   :  { %v1385_v27 = vmin.f32 %v1373_v34, 0.0  ;;  %vm1379_vm3 = vcmp.gt.f32.partialorder %v1373_v34, 0.0 }
 0x3ae   :  { %v1395_v31 = vmul.f32 1.442695, %v1385_v27 }
 0x3af   :  { %v1354_v15 = vpop.f32.mrf.mxu1 }
 0x3b0   :  { %2011 = vpow2.f32 %v1395_v31 }
 0x3b1   :  { %2013 = vpow2.f32 %v1387_v42 }
 0x3b6   :  { %v2012_v37 = vpop.eup %2011 }
 0x3b7   :  { %v1356_v16 = vpop.f32.mrf.mxu1  ;;  %v1888_v29 = vadd.f32 -1.0, %v2012_v37  ;;  %v2014_v61 = vpop.eup %2013 }
 0x3b8   :  { %v1884_v39 = vadd.f32 -1.0, %v2014_v61  ;;  %v1366_v14 = vadd.f32 %v1356_v16, %v2739_v30  ;;  %v1915_v61 = vld [vmem:[%s2803_s1 + $0x70] ss:$0 sm:$0xff] }
 0x3b9   :  { %v1409_v9 = vsel %vm1379_vm3, %v1373_v34, %v1888_v29 }
 0x3ba   :  { %1893 = vmatmul.msk.f32.gmra.mxu2 %vm46_vm0, %v1409_v9  ;;  %v1405_v63 = vsel %vm1375_vm4, %v1369_v1, %v1884_v39  ;;  %v1374_v24 = vadd.f32 %v2744_v10, %v1366_v14  ;;  %v1916_v14 = vld [vmem:[%s2803_s1 + $0x98] ss:$0 sm:$0xff] }
 0x3bc   :  { %v1386_v36 = vmin.f32 %v1374_v24, 0.0  ;;  %vm1380_vm5 = vcmp.gt.f32.partialorder %v1374_v24, 0.0 }
 0x3be   :  { %v1397_v8 = vmul.f32 1.442695, %v1386_v36 }
 0x3bf   :  { %v1359_v38 = vpop.f32.mrf.mxu1 }
 0x3c0   :  { %2015 = vpow2.f32 %v1397_v8 }
 0x3c2   :  { %1894 = vmatmul.msk.f32.vlgmr.msra.gmra.mxu2 %vm46_vm0, %v1405_v63 }
 0x3c3   :  { %1605 = vmatpush.msra.mxu2 %v1586_v44 }
 0x3c5   :  { %1606 = vmatpush.msra.mxu2 %v1585_v19 }
 0x3c6   :  { %v2016_v3 = vpop.eup %2015 }
 0x3c7   :  { %v1889_v25 = vadd.f32 -1.0, %v2016_v3  ;;  %1607 = vmatpush.msra.mxu2 %v1584_v13 }
 0x3c9   :  { %v1410_v35 = vsel %vm1380_vm5, %v1374_v24, %v1889_v25  ;;  %1608 = vmatpush.msra.mxu2 %v1583_v7 }
 0x3ca   :  { %1895 = vmatmul.msk.f32.gmra.mxu2 %vm46_vm0, %v1406_v57 }
 0x3d2   :  { %1896 = vmatmul.msk.f32.gmra.mxu2 %vm46_vm0, %v1407_v22 }
 0x3da   :  { %1897 = vmatmul.msk.f32.gmra.mxu2 %vm46_vm0, %v1408_v0 }
 0x3e2   :  { %1898 = vmatmul.msk.f32.vlgmr.msrb.gmra.mxu2 %vm46_vm0, %v1407_v22 }
 0x3ea   :  { %1899 = vmatmul.msk.f32.gmra.mxu2 %vm46_vm0, %v1408_v0 }
 0x3f2   :  { %1900 = vmatmul.msk.f32.gmra.mxu2 %vm46_vm0, %v1409_v9 }
 0x3fa   :  { %1901 = vmatmul.msk.f32.gmra.mxu2 %vm46_vm0, %v1410_v35 }
 0x40d   :  { %v1442_v12 = vpop.f32.mrf.mxu2 }
 0x41d   :  { %v1445_v58 = vpop.f32.mrf.mxu2 }
 0x42d   :  { %v1448_v30 = vpop.f32.mrf.mxu2 }
 0x43d   :  { %v1451_v18 = vpop.f32.mrf.mxu2 }
 0x445   :  { %v1474_v32 = vpop.f32.mrf.mxu2 }
 0x446   :  { %v1475_v10 = vadd.f32 %v1474_v32, %v1442_v12 }
 0x44d   :  { %v1477_v45 = vpop.f32.mrf.mxu2 }
 0x44e   :  { %v1478_v46 = vadd.f32 %v1477_v45, %v1445_v58 }
 0x455   :  { %v1480_v40 = vpop.f32.mrf.mxu2 }
 0x456   :  { %v1481_v20 = vadd.f32 %v1480_v40, %v1448_v30 }
 0x45d   :  { %v1483_v49 = vpop.f32.mrf.mxu2 }
 0x45e   :  { %v1484_v2 = vadd.f32 %v1483_v49, %v1451_v18 }
 0x465   :  { %v1507_v43 = vpop.f32.mrf.mxu2 }
 0x466   :  { %v1519_v41 = vadd.f32 %v1507_v43, %v1475_v10 }
 0x468   :  { %v1525_v55 = vadd.f32 %v1914_v50, %v1519_v41 }
 0x46a   :  { %v1533_v17 = vmin.f32 %v1525_v55, 0.0  ;;  %vm1529_vm6 = vcmp.gt.f32.partialorder %v1525_v55, 0.0 }
 0x46c   :  { %v1537_v54 = vmul.f32 1.442695, %v1533_v17 }
 0x46d   :  { %v1510_v6 = vpop.f32.mrf.mxu2 }
 0x46e   :  { %v1520_v4 = vadd.f32 %v1510_v6, %v1478_v46  ;;  %2017 = vpow2.f32 %v1537_v54 }
 0x470   :  { %v1526_v62 = vadd.f32 %v1914_v50, %v1520_v4 }
 0x472   :  { %v1534_v57 = vmin.f32 %v1526_v62, 0.0  ;;  %vm1530_vm7 = vcmp.gt.f32.partialorder %v1526_v62, 0.0 }
 0x474   :  { %v1539_v59 = vmul.f32 1.442695, %v1534_v57  ;;  %v2018_v22 = vpop.eup %2017 }
 0x475   :  { %v1513_v48 = vpop.f32.mrf.mxu2  ;;  %v1902_v53 = vadd.f32 -1.0, %v2018_v22 }
 0x476   :  { %2019 = vpow2.f32 %v1539_v59  ;;  %v1521_v51 = vadd.f32 %v1513_v48, %v1481_v20 }
 0x477   :  { %v1549_v5 = vsel %vm1529_vm6, %v1525_v55, %v1902_v53 }
 0x478   :  { %v1527_v21 = vadd.f32 %v1914_v50, %v1521_v51 }
 0x47a   :  { %v1535_v11 = vmin.f32 %v1527_v21, 0.0  ;;  %vm1531_vm8 = vcmp.gt.f32.partialorder %v1527_v21, 0.0 }
 0x47c   :  { %v2020_v47 = vpop.eup %2019  ;;  %v1541_v60 = vmul.f32 1.442695, %v1535_v11 }
 0x47d   :  { %v1903_v52 = vadd.f32 -1.0, %v2020_v47  ;;  %v1516_v33 = vpop.f32.mrf.mxu2 }
 0x47e   :  { %2021 = vpow2.f32 %v1541_v60  ;;  %v1522_v23 = vadd.f32 %v1516_v33, %v1484_v2 }
 0x47f   :  { %v1550_v1 = vsel %vm1530_vm7, %v1526_v62, %v1903_v52 }
 0x480   :  { %v1553_v28 = vadd.f32 %v1550_v1, %v1549_v5  ;;  %v1528_v0 = vadd.f32 %v1914_v50, %v1522_v23 }
 0x482   :  { %v1536_v34 = vmin.f32 %v1528_v0, 0.0  ;;  %vm1532_vm9 = vcmp.gt.f32.partialorder %v1528_v0, 0.0 }
 0x484   :  { %v2022_v26 = vpop.eup %2021  ;;  %v1543_v27 = vmul.f32 1.442695, %v1536_v34 }
 0x485   :  { %v1904_v31 = vadd.f32 -1.0, %v2022_v26 }
 0x486   :  { %2023 = vpow2.f32 %v1543_v27 }
 0x487   :  { %v1551_v15 = vsel %vm1531_vm8, %v1527_v21, %v1904_v31 }
 0x488   :  { %v1554_v42 = vadd.f32 %v1553_v28, %v1551_v15 }
 0x48c   :  { %v2024_v37 = vpop.eup %2023 }
 0x48d   :  { %v1905_v16 = vadd.f32 -1.0, %v2024_v37 }
 0x48f   :  { %v1552_v29 = vsel %vm1532_vm9, %v1528_v0, %v1905_v16 }
 0x490   :  { %v1555_v9 = vadd.f32 %v1554_v42, %v1552_v29 }
 0x492   :  { %1906 = vmatmul.msk.f32.vlgmr.msra.gmra.mxu1 %vm46_vm0, %v1555_v9 }
 0x50f   :  { %v1579_v39 = vpop.f32.mrf.mxu1 }
 0x510   :  { %v1580_v38 = vadd.f32 %v1915_v61, %v1579_v39 }
 0x512   :  { %v1582_v63 = vmax.f32 %v1580_v38, 0.0 }
 0x514   :  { %1907 = vmatmul.msk.f32.vlgmr.msra.gmra.mxu2 %vm1589_vm10, %v1582_v63 }
 0x597   :  { %v1610_v24 = vpop.f32.mrf.mxu2 }
 0x598   :  { %v1611_v36 = vadd.f32 %v1916_v14, %v1610_v24 }
 0x59a   :  { %1613 = vst [vmem:[#allocation2] sm:$0xff] %v1611_v36 }
 0x59b   :  { %1624 = dma.vmem_to_hbm [thread:$0]  %s1620_s6, 128, %s1622_s9, [#allocation3]  }
 0x59c   :  { %2049 = dma.done.wait [#allocation3], 128  }
 0x59d   :  { %2050 = vsyncadd [#allocation3], 4294967168 }
 0x59e   :  { %1629 = vsyncpa [#allocation3], 1 }

</bundles_post_ra>
